<compile_context>
chip_gen: v7x
topology: tpu7x:2x2x1
jax: 0.10.0
libtpu: 0.0.40
codegen_flags: <defaults>
</compile_context>

<pallas_src>
import jax
import jax.numpy as jnp
from jax.experimental import pallas as pl
from jax.experimental.pallas import tpu as pltpu


def actor_kernel(x_ref, w1_ref, b1_ref, w2_ref, b2_ref,
                 w3_ref, b3_ref, w4_ref, b4_ref, o_ref):
    # ---- hidden layer 1 ----
    x = x_ref[...].astype(jnp.bfloat16)
    h = jnp.dot(x, w1_ref[...], preferred_element_type=jnp.float32)
    h = jnp.maximum(h + b1_ref[...], 0.0).astype(jnp.bfloat16)
    # ---- hidden layer 2 ----
    h = jnp.dot(h, w2_ref[...], preferred_element_type=jnp.float32)
    h = jnp.maximum(h + b2_ref[...], 0.0).astype(jnp.bfloat16)
    # ---- hidden layer 3 ----
    h = jnp.dot(h, w3_ref[...], preferred_element_type=jnp.float32)
    h = jnp.maximum(h + b3_ref[...], 0.0).astype(jnp.bfloat16)
    # ---- output layer (act dim padded to 128 lanes; pad bias = -1e9) ----
    logits = jnp.dot(h, w4_ref[...], preferred_element_type=jnp.float32) + b4_ref[...]
    # ---- softmax over dim=1, numerically stable, exact normalization ----
    m = jnp.max(logits, axis=1, keepdims=True)
    e = jnp.exp(logits - m)            # padded columns underflow to exactly 0
    denom = jnp.sum(e, axis=1, keepdims=True)
    o_ref[...] = (e / denom).astype(o_ref.dtype)


def _round_up(n, m):
    return ((n + m - 1) // m) * m


def actor_forward(x, params, *, tile_b=1024):
    """x: (B, obs_dim) f32.  params: dict of transposed bf16 weights / f32 biases."""
    B, obs_dim = x.shape
    hidden = params["w1"].shape[1]
    act_dim = params["w4"].shape[1]

    # ---- lane-dense padding of input / output feature dims ----
    obs_pad = _round_up(max(obs_dim, 128), 128)
    act_pad = _round_up(max(act_dim, 128), 128)
    x_p = jnp.pad(x, ((0, 0), (0, obs_pad - obs_dim)))
    w1 = jnp.pad(params["w1"], ((0, obs_pad - obs_dim), (0, 0)))
    w4 = jnp.pad(params["w4"], ((0, 0), (0, act_pad - act_dim)))
    b4 = jnp.pad(params["b4"], ((0, 0), (0, act_pad - act_dim)),
                 constant_values=-1e9)  # finite, so no inf-inf / NaN in max-subtract

    # ---- batch tile: large (amortize per-step overhead) but keep >= 2 steps ----
    tb = min(tile_b, B)
    if B >= 512:
        cap = _round_up(pl.cdiv(B, 2), 256)   # >= 2 parallel steps for v7x megacore
        tb = min(tb, cap)
    grid = (pl.cdiv(B, tb),)

    # Resident (constant index_map) specs for weights / biases.
    def resident(arr):
        return pl.BlockSpec(arr.shape, lambda i: (0, 0))

    in_specs = [
        pl.BlockSpec((tb, obs_pad), lambda i: (i, 0)),        # x tile (pipelined)
        resident(w1), resident(params["b1"]),
        resident(params["w2"]), resident(params["b2"]),
        resident(params["w3"]), resident(params["b3"]),
        resident(w4), resident(b4),
    ]
    out_spec = pl.BlockSpec((tb, act_pad), lambda i: (i, 0))

    # Advisory cost estimate for the XLA scheduler (true, unpadded work).
    flops = 2 * B * (obs_dim * hidden + 2 * hidden * hidden + hidden * act_dim)
    bytes_weights = sum(int(params[k].size) * params[k].dtype.itemsize
                        for k in params)
    bytes_accessed = x.size * x.dtype.itemsize + bytes_weights + B * act_pad * 4
    cost = pl.CostEstimate(flops=flops, transcendentals=B * act_pad,
                           bytes_accessed=bytes_accessed)

    args = (x_p, w1, params["b1"], params["w2"], params["b2"],
            params["w3"], params["b3"], w4, b4)

    out_padded = pl.pallas_call(
        actor_kernel,
        out_shape=jax.ShapeDtypeStruct((B, act_pad), jnp.float32),
        grid_spec=pltpu.PrefetchScalarGridSpec(
            num_scalar_prefetch=0,
            grid=grid,
            in_specs=in_specs,
            out_specs=out_spec,
        ),
        compiler_params=pltpu.CompilerParams(
            dimension_semantics=("parallel",)),
        cost_estimate=cost,
    )(*args)
    return out_padded[:, :act_dim]


def init_params(key, obs_dim, hidden, act_dim):
    """Deterministic synthetic init (uniform like nn.Linear default).
    Weights are stored as (in, out) == PyTorch weight.T, in bfloat16 for the MXU;
    biases stay float32."""
    dims = [(obs_dim, hidden), (hidden, hidden), (hidden, hidden), (hidden, act_dim)]
    params = {}
    keys = jax.random.split(key, 2 * len(dims))
    for i, (din, dout) in enumerate(dims):
        bound = 1.0 / jnp.sqrt(jnp.float32(din))
        w = jax.random.uniform(keys[2 * i], (din, dout), jnp.float32, -bound, bound)
        b = jax.random.uniform(keys[2 * i + 1], (1, dout), jnp.float32, -bound, bound)
        params[f"w{i + 1}"] = w.astype(jnp.bfloat16)
        params[f"b{i + 1}"] = b
    return params


def actor_ref(x, params):
    """Pure-JAX reference using the same bf16 operands / f32 accumulation."""
    def lin(h, w, b):
        return jnp.dot(h.astype(jnp.bfloat16), w,
                       preferred_element_type=jnp.float32) + b
    h = jnp.maximum(lin(x, params["w1"], params["b1"]), 0.0)
    h = jnp.maximum(lin(h, params["w2"], params["b2"]), 0.0)
    h = jnp.maximum(lin(h, params["w3"], params["b3"]), 0.0)
    logits = lin(h, params["w4"], params["b4"])
    return jax.nn.softmax(logits, axis=1)


if __name__ == "__main__":
    key = jax.random.PRNGKey(0)
    k_par, k_x = jax.random.split(key)

    # Hidden size is fixed at 256 by the module; obs/act dims and batch are the
    # free example sizes.  B=512 exercises a 2-step (megacore-parallel) grid.
    BATCH, OBS_DIM, HIDDEN, ACT_DIM = 512, 32, 256, 8
    params = init_params(k_par, OBS_DIM, HIDDEN, ACT_DIM)
    x = jax.random.normal(k_x, (BATCH, OBS_DIM), jnp.float32)

    out = actor_forward(x, params)
    out = jax.block_until_ready(out)

    ref = actor_ref(x, params)
    assert out.shape == (BATCH, ACT_DIM)
    # bf16 operands -> loosened tolerance vs. the matched pure-JAX reference.
    assert jnp.allclose(out, ref, atol=2e-3, rtol=2e-3)
    # Exact softmax normalization in the kernel -> rows sum to 1 tightly.
    assert jnp.allclose(jnp.sum(out, axis=1), 1.0, atol=1e-4)

    print("KERNEL_OK")
</pallas_src>

<mosaic_0001>
module attributes {stable_mosaic.version = 11 : i64} {
  func.func @actor_kernel(%arg0: i32, %arg1: memref<256x128xf32, #tpu.memory_space<vmem>>, %arg2: memref<128x256xbf16, #tpu.memory_space<vmem>>, %arg3: memref<1x256xf32, #tpu.memory_space<vmem>>, %arg4: memref<256x256xbf16, #tpu.memory_space<vmem>>, %arg5: memref<1x256xf32, #tpu.memory_space<vmem>>, %arg6: memref<256x256xbf16, #tpu.memory_space<vmem>>, %arg7: memref<1x256xf32, #tpu.memory_space<vmem>>, %arg8: memref<256x128xbf16, #tpu.memory_space<vmem>>, %arg9: memref<1x128xf32, #tpu.memory_space<vmem>>, %arg10: memref<256x128xf32, #tpu.memory_space<vmem>>) attributes {dimension_semantics = [#tpu.dimension_semantics<parallel>], iteration_bounds = array<i64: 2>, scalar_prefetch = 0 : i64, scratch_operands = 0 : i64, tpu.core_type = #tpu.core_type<tc>, window_params = [{transform_indices = @transform_0, window_bounds = array<i64: 256, 128>}, {pipeline_mode = #tpu.pipeline_mode<synchronous>, transform_indices = @transform_1, window_bounds = array<i64: 128, 256>}, {pipeline_mode = #tpu.pipeline_mode<synchronous>, transform_indices = @transform_2, window_bounds = array<i64: 1, 256>}, {pipeline_mode = #tpu.pipeline_mode<synchronous>, transform_indices = @transform_3, window_bounds = array<i64: 256, 256>}, {pipeline_mode = #tpu.pipeline_mode<synchronous>, transform_indices = @transform_4, window_bounds = array<i64: 1, 256>}, {pipeline_mode = #tpu.pipeline_mode<synchronous>, transform_indices = @transform_5, window_bounds = array<i64: 256, 256>}, {pipeline_mode = #tpu.pipeline_mode<synchronous>, transform_indices = @transform_6, window_bounds = array<i64: 1, 256>}, {pipeline_mode = #tpu.pipeline_mode<synchronous>, transform_indices = @transform_7, window_bounds = array<i64: 256, 128>}, {pipeline_mode = #tpu.pipeline_mode<synchronous>, transform_indices = @transform_8, window_bounds = array<i64: 1, 128>}, {transform_indices = @transform_9, window_bounds = array<i64: 256, 128>}]} {
    %c0 = arith.constant 0 : index
    %c0_0 = arith.constant 0 : index
    %0 = vector.load %arg1[%c0, %c0_0] : memref<256x128xf32, #tpu.memory_space<vmem>>, vector<256x128xf32>
    %1 = arith.truncf %0 : vector<256x128xf32> to vector<256x128xbf16>
    %c0_1 = arith.constant 0 : index
    %c0_2 = arith.constant 0 : index
    %2 = vector.load %arg2[%c0_1, %c0_2] : memref<128x256xbf16, #tpu.memory_space<vmem>>, vector<128x256xbf16>
    %cst = arith.constant dense<0.000000e+00> : vector<256x256xf32>
    %3 = tpu.matmul %1, %2, %cst {dimension_numbers = #tpu.dot_dimension_numbers<[1], [0], [0], [1], [0, 0, 1, 1], [], []>} : vector<256x128xbf16>, vector<128x256xbf16>, vector<256x256xf32> -> vector<256x256xf32>
    %c0_3 = arith.constant 0 : index
    %c0_4 = arith.constant 0 : index
    %4 = vector.load %arg3[%c0_3, %c0_4] : memref<1x256xf32, #tpu.memory_space<vmem>>, vector<1x256xf32>
    %5 = vector.broadcast %4 : vector<1x256xf32> to vector<256x256xf32>
    %6 = arith.addf %3, %5 : vector<256x256xf32>
    %cst_5 = arith.constant 0.000000e+00 : f32
    %7 = vector.broadcast %cst_5 : f32 to vector<256x256xf32>
    %8 = arith.maximumf %6, %7 : vector<256x256xf32>
    %9 = arith.truncf %8 : vector<256x256xf32> to vector<256x256xbf16>
    %c0_6 = arith.constant 0 : index
    %c0_7 = arith.constant 0 : index
    %10 = vector.load %arg4[%c0_6, %c0_7] : memref<256x256xbf16, #tpu.memory_space<vmem>>, vector<256x256xbf16>
    %cst_8 = arith.constant dense<0.000000e+00> : vector<256x256xf32>
    %11 = tpu.matmul %9, %10, %cst_8 {dimension_numbers = #tpu.dot_dimension_numbers<[1], [0], [0], [1], [0, 0, 1, 1], [], []>} : vector<256x256xbf16>, vector<256x256xbf16>, vector<256x256xf32> -> vector<256x256xf32>
    %c0_9 = arith.constant 0 : index
    %c0_10 = arith.constant 0 : index
    %12 = vector.load %arg5[%c0_9, %c0_10] : memref<1x256xf32, #tpu.memory_space<vmem>>, vector<1x256xf32>
    %13 = vector.broadcast %12 : vector<1x256xf32> to vector<256x256xf32>
    %14 = arith.addf %11, %13 : vector<256x256xf32>
    %cst_11 = arith.constant 0.000000e+00 : f32
    %15 = vector.broadcast %cst_11 : f32 to vector<256x256xf32>
    %16 = arith.maximumf %14, %15 : vector<256x256xf32>
    %17 = arith.truncf %16 : vector<256x256xf32> to vector<256x256xbf16>
    %c0_12 = arith.constant 0 : index
    %c0_13 = arith.constant 0 : index
    %18 = vector.load %arg6[%c0_12, %c0_13] : memref<256x256xbf16, #tpu.memory_space<vmem>>, vector<256x256xbf16>
    %cst_14 = arith.constant dense<0.000000e+00> : vector<256x256xf32>
    %19 = tpu.matmul %17, %18, %cst_14 {dimension_numbers = #tpu.dot_dimension_numbers<[1], [0], [0], [1], [0, 0, 1, 1], [], []>} : vector<256x256xbf16>, vector<256x256xbf16>, vector<256x256xf32> -> vector<256x256xf32>
    %c0_15 = arith.constant 0 : index
    %c0_16 = arith.constant 0 : index
    %20 = vector.load %arg7[%c0_15, %c0_16] : memref<1x256xf32, #tpu.memory_space<vmem>>, vector<1x256xf32>
    %21 = vector.broadcast %20 : vector<1x256xf32> to vector<256x256xf32>
    %22 = arith.addf %19, %21 : vector<256x256xf32>
    %cst_17 = arith.constant 0.000000e+00 : f32
    %23 = vector.broadcast %cst_17 : f32 to vector<256x256xf32>
    %24 = arith.maximumf %22, %23 : vector<256x256xf32>
    %25 = arith.truncf %24 : vector<256x256xf32> to vector<256x256xbf16>
    %c0_18 = arith.constant 0 : index
    %c0_19 = arith.constant 0 : index
    %26 = vector.load %arg8[%c0_18, %c0_19] : memref<256x128xbf16, #tpu.memory_space<vmem>>, vector<256x128xbf16>
    %cst_20 = arith.constant dense<0.000000e+00> : vector<256x128xf32>
    %27 = tpu.matmul %25, %26, %cst_20 {dimension_numbers = #tpu.dot_dimension_numbers<[1], [0], [0], [1], [0, 0, 1, 1], [], []>} : vector<256x256xbf16>, vector<256x128xbf16>, vector<256x128xf32> -> vector<256x128xf32>
    %c0_21 = arith.constant 0 : index
    %c0_22 = arith.constant 0 : index
    %28 = vector.load %arg9[%c0_21, %c0_22] : memref<1x128xf32, #tpu.memory_space<vmem>>, vector<1x128xf32>
    %29 = vector.broadcast %28 : vector<1x128xf32> to vector<256x128xf32>
    %30 = arith.addf %27, %29 : vector<256x128xf32>
    %cst_23 = arith.constant dense<0xFF800000> : vector<256xf32>
    %31 = vector.multi_reduction <maximumf>, %30, %cst_23 [1] : vector<256x128xf32> to vector<256xf32>
    %32 = vector.shape_cast %31 : vector<256xf32> to vector<256x1xf32>
    %33 = vector.broadcast %32 : vector<256x1xf32> to vector<256x128xf32>
    %34 = arith.subf %30, %33 : vector<256x128xf32>
    %35 = math.exp %34 : vector<256x128xf32>
    %cst_24 = arith.constant dense<0.000000e+00> : vector<256xf32>
    %36 = vector.multi_reduction <add>, %35, %cst_24 [1] : vector<256x128xf32> to vector<256xf32>
    %37 = vector.shape_cast %36 : vector<256xf32> to vector<256x1xf32>
    %38 = vector.broadcast %37 : vector<256x1xf32> to vector<256x128xf32>
    %39 = arith.divf %35, %38 : vector<256x128xf32>
    %c0_25 = arith.constant 0 : index
    %c0_26 = arith.constant 0 : index
    %40 = vector.load %arg10[%c0_25, %c0_26] : memref<256x128xf32, #tpu.memory_space<vmem>>, vector<256x128xf32>
    tpu.vector_store %arg10[%c0_25, %c0_26], %39 {strides = array<i32>} : memref<256x128xf32, #tpu.memory_space<vmem>>, vector<256x128xf32>,
    return
  }
  func.func @transform_0(%arg0: i32) -> (i32, i32) {
    %c0_i32 = arith.constant 0 : i32
    %c0_i32_0 = arith.constant 0 : i32
    return %arg0, %c0_i32 : i32, i32
  }
  func.func @transform_1(%arg0: i32) -> (i32, i32) {
    %c0_i32 = arith.constant 0 : i32
    %c0_i32_0 = arith.constant 0 : i32
    %c0_i32_1 = arith.constant 0 : i32
    return %c0_i32, %c0_i32_0 : i32, i32
  }
  func.func @transform_2(%arg0: i32) -> (i32, i32) {
    %c0_i32 = arith.constant 0 : i32
    %c0_i32_0 = arith.constant 0 : i32
    %c0_i32_1 = arith.constant 0 : i32
    return %c0_i32, %c0_i32_0 : i32, i32
  }
  func.func @transform_3(%arg0: i32) -> (i32, i32) {
    %c0_i32 = arith.constant 0 : i32
    %c0_i32_0 = arith.constant 0 : i32
    %c0_i32_1 = arith.constant 0 : i32
    return %c0_i32, %c0_i32_0 : i32, i32
  }
  func.func @transform_4(%arg0: i32) -> (i32, i32) {
    %c0_i32 = arith.constant 0 : i32
    %c0_i32_0 = arith.constant 0 : i32
    %c0_i32_1 = arith.constant 0 : i32
    return %c0_i32, %c0_i32_0 : i32, i32
  }
  func.func @transform_5(%arg0: i32) -> (i32, i32) {
    %c0_i32 = arith.constant 0 : i32
    %c0_i32_0 = arith.constant 0 : i32
    %c0_i32_1 = arith.constant 0 : i32
    return %c0_i32, %c0_i32_0 : i32, i32
  }
  func.func @transform_6(%arg0: i32) -> (i32, i32) {
    %c0_i32 = arith.constant 0 : i32
    %c0_i32_0 = arith.constant 0 : i32
    %c0_i32_1 = arith.constant 0 : i32
    return %c0_i32, %c0_i32_0 : i32, i32
  }
  func.func @transform_7(%arg0: i32) -> (i32, i32) {
    %c0_i32 = arith.constant 0 : i32
    %c0_i32_0 = arith.constant 0 : i32
    %c0_i32_1 = arith.constant 0 : i32
    return %c0_i32, %c0_i32_0 : i32, i32
  }
  func.func @transform_8(%arg0: i32) -> (i32, i32) {
    %c0_i32 = arith.constant 0 : i32
    %c0_i32_0 = arith.constant 0 : i32
    %c0_i32_1 = arith.constant 0 : i32
    return %c0_i32, %c0_i32_0 : i32, i32
  }
  func.func @transform_9(%arg0: i32) -> (i32, i32) {
    %c0_i32 = arith.constant 0 : i32
    %c0_i32_0 = arith.constant 0 : i32
    return %arg0, %c0_i32 : i32, i32
  }
}

</mosaic_0001>

<bundles_post_ra>
// kernel: tpu_custom_call.1
= control target key start
LH: loop header
LB: loop body
LE: loop exit
PB: predicated region body
PF: predicated region fallthrough
CT: control target
= control target key end

     0   :  { %s4366_s0 = inlined_call_operand.hbm [shape: f32[512,128], index: 0, kind: input, shape index: {}]   ;;  %s4367_s1 = inlined_call_operand.hbm [shape: bf16[128,256], index: 1, kind: input, shape index: {}]   ;;  %s4368_s2 = inlined_call_operand.vmem [shape: f32[1,256], index: 2, kind: input, shape index: {}]   ;;  %s4369_s3 = inlined_call_operand.hbm [shape: bf16[256,256], index: 3, kind: input, shape index: {}]   ;;  %s4370_s4 = inlined_call_operand.vmem [shape: f32[1,256], index: 4, kind: input, shape index: {}]   ;;  %s4371_s5 = inlined_call_operand.hbm [shape: bf16[256,256], index: 5, kind: input, shape index: {}]   ;;  %s4372_s6 = inlined_call_operand.vmem [shape: f32[1,256], index: 6, kind: input, shape index: {}]   ;;  %s4373_s7 = inlined_call_operand.hbm [shape: bf16[256,128], index: 7, kind: input, shape index: {}]   ;;  %s4374_s8 = inlined_call_operand.vmem [shape: f32[1,128], index: 8, kind: input, shape index: {}]   ;;  %s4375_s9 = inlined_call_operand.hbm [shape: f32[512,128], index: 9, kind: output, shape index: {}]  }
   0x1   :  { %4382 = sst [smem:[#allocation18_spill]] %s4375_s9 }
   0x2   :  { %14 = vsyncpa [#allocation3], 0 }
   0x3   :  { %16 = vsyncpa [#allocation3 + $0x1], 0 }
   0x4   :  { %17 = vsyncpa [#allocation6], 0 }
   0x5   :  { %18 = vsyncpa [#allocation9], 0 }
   0x6   :  { %19 = vsyncpa [#allocation4], 0 }
   0x7   :  { %21 = vsyncpa [#allocation4 + $0x1], 0  ;;  %s3472_s30 = smov 0   ;;  %s3474_s10 = smov 0  }
   0x8   :  { %s3476_s11 = smov 0   ;;  %s3478_s12 = smov 0  }
   0x9 LB: > { %4383 = sst [smem:[#allocation16_spill]] %s3395_s30  ;;  %s3493_s13 = sadd.s32 4294967295, %s3407_s12   ;;  %s3407_s12 = sphi %s3478_s12, %s4408_s12   ;;  %s3403_s11 = sphi %s3476_s11, %s4407_s11   ;;  %s3399_s10 = sphi %s3474_s10, %s4406_s10   ;;  %s3395_s30 = sphi %s3472_s30, %s4405_s30  }
   0xa   : > { %s2584_s14 = sadd.s32 4294967294, %s3407_s12   ;;  %p47_p0 = scmp.ne.s32.totalorder %s3399_s10, %s3395_s30 }
   0xb   : > { %p4376_p1 = scmp.eq.s32.totalorder %s3493_s13, 0  ;;  %p245_p3 = scmp.eq.s32.totalorder %s2584_s14, 1 }
   0xc   : > { %p2585_p5 = scmp.ge.s32.totalorder %s3407_s12, 1  ;;  %p252_p7 = scmp.lt.s32.totalorder %s3407_s12, 3 }
   0xd   : > { %p3502_p4 = por %p4376_p1, %p47_p0  ;;  %p3507_p6 = por %p245_p3, %p47_p0 }
   0xe   : > { %p3512_p8 = pnand %p2585_p5, %p252_p7  ;;  %s3409_s18 = smov [#allocation5]  }
   0xf   : > { %s4384_s15 = scalar_select %p3502_p4, 1, 0 }
  0x10   : > { %s4385_s16 = scalar_select %p3507_p6, 1, 0 }
  0x11   : > { %s4387_s17 = scalar_select %p3512_p8, 1, 0 }
  0x12   : > { %4386 = sst [smem:[#allocation17_spill]] %s4385_s16  ;;  %s264_s19 = sshll.u32 %s3409_s18, 4  ;;  %s3516_s19 = int_to_ptr.vmem [resolvable:$true] %s264_s19 }
  0x13   : > { %p2853_p9 = pneg %p3512_p8  ;;  %s3410_s21 = smov [#allocation8]  }
  0x14   : > { %s296_s22 = sshll.u32 %s3410_s21, 4  ;;  %s3411_s23 = smov [#allocation7]   ;;  %s3527_s22 = int_to_ptr.vmem [resolvable:$true] %s296_s22 }
  0x15   : > { %p3523_p11 = pnand %p2853_p9, %p4376_p1  ;;  %s3529_s24 = sshll.u32 %s3411_s23, 4  ;;  %s281_s24 = int_to_ptr.vmem [resolvable:$true] %s3529_s24 }
  0x16   : > { %s3191_s27 = scalar_lea.hbm %s4367_s1, 2048 }
  0x17   : > { %p3192_p12 = scmp.ne.s32.totalorder %s4367_s1, %s3191_s27  ;;  %p3539_p13 = pneg %p3523_p11 }
  0x18   : > { %p3198_p5 = scmp.lt.u32.totalorder %s3191_s27, %s4367_s1 }
  0x19   : > { %p3194_p0 = pnand %p3539_p13, %p3192_p12 }
  0x1b   : > { %p3195_p3 = pneg %p3194_p0 }
  0x1d   : > { %p3200_p7 = pnand %p3198_p5, %p3195_p3 }
  0x1f   : > { %3203 = shalt.err (!%p3200_p7)
}
  0x20   : > { %s3204_s23 = scalar_lea.vmem %s3516_s19, 2048  ;;  %p3212_p2 = scmp.lt.s32.totalorder %s3516_s19, %s3516_s19 }
  0x21   : > { %p3205_p9 = scmp.ne.s32.totalorder %s3516_s19, %s3204_s23  ;;  %p3213_p6 = scmp.lt.s32.totalorder %s3204_s23, %s3204_s23 }
  0x23   : > { %p3207_p10 = pnand %p3205_p9, %p3539_p13  ;;  %p3214_p12 = por %p3213_p6, %p3212_p2 }
  0x25   : > { %p3208_p1 = pneg %p3207_p10 }
  0x27   : > { %p3215_p0 = pnand %p3214_p12, %p3208_p1 }
  0x29   : > { %3218 = shalt.err (!%p3215_p0)
}
  0x2a   : > { %s3412_s25 = smov 128   ;;  %s3413_s26 = smov 8  }
  0x2b   : > { %2856 = dma.hbm_to_vmem [thread:$0]  (!%p3523_p11), %s4367_s1, 2048, %s3516_s19, [#allocation6], %s3412_s25, %s3412_s25, %s3413_s26  }
  0x2c   : > { %s3219_s21 = scalar_lea.hbm %s4371_s5, 4096 }
  0x2d   : > { %p3220_p1 = scmp.ne.s32.totalorder %s4371_s5, %s3219_s21  ;;  %p3226_p10 = scmp.lt.u32.totalorder %s3219_s21, %s4371_s5 }
  0x2f   : > { %p3222_p2 = pnand %p3220_p1, %p3539_p13 }
  0x31   : > { %p3223_p6 = pneg %p3222_p2 }
  0x33   : > { %p3228_p3 = pnand %p3226_p10, %p3223_p6 }
  0x35   : > { %3231 = shalt.err (!%p3228_p3)
}
  0x36   : > { %s3232_s19 = scalar_lea.vmem %s3527_s22, 4096  ;;  %p3240_p12 = scmp.lt.s32.totalorder %s3527_s22, %s3527_s22 }
  0x37   : > { %p3233_p5 = scmp.ne.s32.totalorder %s3527_s22, %s3232_s19  ;;  %p3241_p0 = scmp.lt.s32.totalorder %s3232_s19, %s3232_s19 }
  0x39   : > { %p3235_p7 = pnand %p3233_p5, %p3539_p13  ;;  %p3242_p1 = por %p3241_p0, %p3240_p12 }
  0x3b   : > { %p3236_p9 = pneg %p3235_p7 }
  0x3d   : > { %p3243_p2 = pnand %p3242_p1, %p3236_p9 }
  0x3f   : > { %3246 = shalt.err (!%p3243_p2)
}
  0x40   : > { %2862 = dma.hbm_to_vmem [thread:$0]  (!%p3523_p11), %s4371_s5, 4096, %s3527_s22, [#allocation9], %s3412_s25, %s3412_s25, %s3413_s26  }
  0x41   : > { %s3247_s28 = scalar_lea.hbm %s4369_s3, 4096 }
  0x42   : > { %p3248_p6 = scmp.ne.s32.totalorder %s4369_s3, %s3247_s28  ;;  %p3254_p5 = scmp.lt.u32.totalorder %s3247_s28, %s4369_s3 }
  0x44   : > { %p3250_p10 = pnand %p3248_p6, %p3539_p13 }
  0x46   : > { %p3251_p3 = pneg %p3250_p10 }
  0x48   : > { %p3256_p7 = pnand %p3254_p5, %p3251_p3 }
  0x4a   : > { %3259 = shalt.err (!%p3256_p7)
}
  0x4b   : > { %s3260_s19 = scalar_lea.vmem %s281_s24, 4096  ;;  %p3268_p1 = scmp.lt.s32.totalorder %s281_s24, %s281_s24 }
  0x4c   : > { %p3261_p9 = scmp.ne.s32.totalorder %s281_s24, %s3260_s19  ;;  %p3269_p2 = scmp.lt.s32.totalorder %s3260_s19, %s3260_s19 }
  0x4e   : > { %p3263_p12 = pnand %p3261_p9, %p3539_p13  ;;  %p3270_p4 = por %p3269_p2, %p3268_p1 }
  0x50   : > { %p3264_p0 = pneg %p3263_p12 }
  0x52   : > { %p3271_p8 = pnand %p3270_p4, %p3264_p0 }
  0x54   : > { %3274 = shalt.err (!%p3271_p8)
}
  0x55   : > { %2859 = dma.hbm_to_vmem [thread:$0]  (!%p3523_p11), %s4369_s3, 4096, %s281_s24, [#allocation6], %s3412_s25, %s3412_s25, %s3413_s26  }
  0x56   : > { %s3414_s30 = smov [#allocation10]   ;;  %s3275_s29 = scalar_lea.hbm %s4373_s7, 2048 }
  0x57   : > { %s312_s16 = sshll.u32 %s3414_s30, 4  ;;  %p3276_p4 = scmp.ne.s32.totalorder %s4373_s7, %s3275_s29  ;;  %s313_s16 = int_to_ptr.vmem [resolvable:$true] %s312_s16 }
  0x58   : > { %p3282_p10 = scmp.lt.u32.totalorder %s3275_s29, %s4373_s7 }
  0x59   : > { %p3278_p8 = pnand %p3276_p4, %p3539_p13 }
  0x5b   : > { %p3279_p6 = pneg %p3278_p8 }
  0x5d   : > { %p3284_p3 = pnand %p3282_p10, %p3279_p6 }
  0x5f   : > { %3287 = shalt.err (!%p3284_p3)
}
  0x60   : > { %s3288_s24 = scalar_lea.vmem %s313_s16, 2048  ;;  %p3296_p12 = scmp.lt.s32.totalorder %s313_s16, %s313_s16 }
  0x61   : > { %p3289_p5 = scmp.ne.s32.totalorder %s313_s16, %s3288_s24  ;;  %p3297_p0 = scmp.lt.s32.totalorder %s3288_s24, %s3288_s24 }
  0x63   : > { %p3291_p7 = pnand %p3289_p5, %p3539_p13  ;;  %p3298_p1 = por %p3297_p0, %p3296_p12 }
  0x65   : > { %p3292_p9 = pneg %p3291_p7 }
  0x67   : > { %p3299_p2 = pnand %p3298_p1, %p3292_p9 }
  0x69   : > { %3302 = shalt.err (!%p3299_p2)
}
  0x6a   : > { %s3415_s22 = smov 64   ;;  %s3416_s14 = smov 4  }
  0x6b   : > { %2865 = dma.hbm_to_vmem [thread:$0]  (!%p3523_p11), %s4373_s7, 2048, %s313_s16, [#allocation9], %s3415_s22, %s3415_s22, %s3416_s14  }
  0x6c   : > { %s3630_s27 = sadd.s32 1, %s3407_s12   ;;  %s34_s29 = sadd.s32 1, %s3403_s11 }
  0x6d   : > { %s31_s28 = ssub.s32 %s3407_s12, %s3630_s27  ;;  %p41_p4 = scmp.ne.s32.totalorder %s3403_s11, %s3399_s10 }
  0x6e   : > { %p32_p13 = scmp.eq.s32.totalorder %s31_s28, 0  ;;  %p42_p8 = scmp.eq.s32.totalorder %s3407_s12, 0 }
  0x6f   : > { %p4390_p10 = scmp.eq.s32.totalorder %s3493_s13, 1  ;;  %p2878_p5 = scmp.lt.s32.totalorder %s3407_s12, 2 }
  0x70   : > { %s3639_s18 = scalar_select %p32_p13, %s3403_s11, %s34_s29  }
  0x71   : > { %p43_p6 = por %p42_p8, %p41_p4  ;;  %p3643_p3 = por %p4390_p10, %p41_p4 }
  0x72   : > { %s329_s20 = sand.u32 1, %s3403_s11   ;;  %s2703_s16 = sshll.u32 %s3407_s12, 12 }
  0x73   : > { %s2591_s23 = sshll.u32 %s329_s20, 8  ;;  %s3653_s22 = scalar_lea.hbm %s4366_s0, %s2703_s16 }
  0x74   : > { %s333_s14 = scalar_lea.vmem [#allocation2], %s2591_s23  ;;  %p3657_p11 = pnand %p2878_p5, %p43_p6 }
  0x75   : > { %s340_s9 = sshll.u32 %s333_s14, 4  ;;  %s3661_s28 = scalar_lea.sflag [#allocation3], %s329_s20  ;;  %s3655_s9 = int_to_ptr.vmem [resolvable:$true] %s340_s9 }
  0x76   : > { %s3303_s29 = scalar_lea.hbm %s3653_s22, 4096  ;;  %p3305_p9 = pneg %p3657_p11 }
  0x77   : > { %p3304_p7 = scmp.ne.s32.totalorder %s3653_s22, %s3303_s29  ;;  %s3308_s19 = scalar_lea.hbm %s4366_s0, 8192 }
  0x78   : > { %p3309_p1 = scmp.lt.u32.totalorder %s3653_s22, %s4366_s0  ;;  %p3310_p2 = scmp.lt.u32.totalorder %s3308_s19, %s3303_s29 }
  0x79   : > { %p3306_p12 = pnand %p3305_p9, %p3304_p7  ;;  %p3312_p4 = scmp.lt.u32.totalorder %s3303_s29, %s3653_s22 }
  0x7a   : > { %p3311_p13 = por %p3310_p2, %p3309_p1 }
  0x7b   : > { %p3307_p0 = pneg %p3306_p12 }
  0x7c   : > { %p3313_p8 = por %p3312_p4, %p3311_p13 }
  0x7e   : > { %p3314_p6 = pnand %p3313_p8, %p3307_p0 }
  0x80   : > { %3317 = shalt.err (!%p3314_p6)
}
  0x81   : > { %s3318_s20 = scalar_lea.vmem %s3655_s9, 4096  ;;  %s3417_s23 = smov [#allocation2]  }
  0x82   : > { %p3319_p10 = scmp.ne.s32.totalorder %s3655_s9, %s3318_s20  ;;  %s3323_s16 = sshll.u32 %s3417_s23, 4  ;;  %s3324_s16 = int_to_ptr.vmem [resolvable:$false] %s3323_s16 }
  0x83   : > { %s3325_s24 = scalar_lea.vmem %s3324_s16, 8192  ;;  %p3326_p12 = scmp.lt.s32.totalorder %s3655_s9, %s3324_s16 }
  0x84   : > { %p3321_p5 = pnand %p3319_p10, %p3305_p9  ;;  %p3327_p1 = scmp.lt.s32.totalorder %s3325_s24, %s3318_s20 }
  0x86   : > { %p3322_p7 = pneg %p3321_p5  ;;  %p3328_p2 = por %p3327_p1, %p3326_p12 }
  0x88   : > { %p3329_p13 = pnand %p3328_p2, %p3322_p7 }
  0x8a   : > { %3332 = shalt.err (!%p3329_p13)
}
  0x8b   : > { %2869 = dma.hbm_to_vmem [thread:$0]  (!%p3657_p11), %s3653_s22, 4096, %s3655_s9, %s3661_s28, %s3412_s25, %s3412_s25, %s3413_s26  }
  0x8c   : > { %p4393_p9 = scmp.ne.s32.totalorder %s4387_s17, 0 }
  0x8d   : > { %s3695_s29 = sand.u32 (!%p4393_p9), 1, %s3399_s10   ;;  %p4394_p0 = scmp.ne.s32.totalorder (!%p4393_p9), %s4384_s15, 0 }
  0x8e   : > { %352 = sbr.rel (%p4393_p9) target bundleno = 1522 (0x5f2), region = 56  ;;  %s2595_s19 = sshll.u32 (!%p4393_p9), %s3695_s29, 8 }
  0x8f   : > { %s355_s14 = scalar_lea.sflag (!%p4393_p9), [#allocation3], %s3695_s29  ;;  %s3701_s30 = scalar_lea.vmem (!%p4393_p9), [#allocation2], %s2595_s19 }
  0x95   : > { %3378 = dma.done.wait (%p4394_p0), %s355_s14, 4096  }
  0x96   : > { %3380 = vsyncadd (%p4394_p0), %s355_s14, 4294963200  ;;  %p4395_p11 = scmp.eq.s32.totalorder %s3493_s13, 0 }
  0x98   : > { %3382 = dma.done.wait (%p4395_p11), [#allocation6], 6144   ;;  %p4396_p4 = pmov %p4395_p11 }
  0x9a   : > { %3384 = vsyncadd (%p4396_p4), [#allocation6], 4294961152  ;;  %p4397_p8 = pmov %p4396_p4 }
  0x9b   : > { %p4398_p6 = pmov %p4396_p4 }
  0x9c   : > { %3386 = dma.done.wait (%p4397_p8), [#allocation9], 6144  }
  0x9d   : > { %3388 = vsyncadd (%p4398_p6), [#allocation9], 4294961152  ;;  %v3418_v0 = vmov 0   ;;  %v2927_v1 = vld [vmem:[#allocation5 + $0x4] ss:$8 sps:$4 sm:$0xff]   ;;  %v414_v27 = vld [vmem:[%s3701_s30 + $0x10] sm:$0xff] }
  0x9e   : > { %600 = vmatprep.mubr.bf16.mxu0 %v3418_v0  ;;  %v2929_v2 = vld [vmem:[#allocation5] ss:$8 sps:$4 sm:$0xff]   ;;  %568 = vmatprep.subr.bf16.mxu0 %v2927_v1  ;;  %v2930_v3 = vld [vmem:[#allocation5 + $0x14] ss:$8 sps:$4 sm:$0xff]   ;;  %v2932_v4 = vld [vmem:[#allocation5 + $0x10] ss:$8 sps:$4 sm:$0xff]  }
  0x9f   : > { %569 = vmatpush1.bf16.msra.mxu0 %v2929_v2  ;;  %v2933_v5 = vld [vmem:[#allocation5 + $0x24] ss:$8 sps:$4 sm:$0xff]   ;;  %v2935_v6 = vld [vmem:[#allocation5 + $0x20] ss:$8 sps:$4 sm:$0xff]   ;;  %v2936_v7 = vld [vmem:[#allocation5 + $0x34] ss:$8 sps:$4 sm:$0xff]  }
  0xa0   : > { %570 = vmatprep.subr.bf16.mxu0 %v2930_v3  ;;  %v2938_v8 = vld [vmem:[#allocation5 + $0x30] ss:$8 sps:$4 sm:$0xff]   ;;  %v2939_v9 = vld [vmem:[#allocation5 + $0x44] ss:$8 sps:$4 sm:$0xff]   ;;  %v2941_v10 = vld [vmem:[#allocation5 + $0x40] ss:$8 sps:$4 sm:$0xff]  }
  0xa1   : > { %v2942_v11 = vld [vmem:[#allocation5 + $0x54] ss:$8 sps:$4 sm:$0xff]   ;;  %v2944_v12 = vld [vmem:[#allocation5 + $0x50] ss:$8 sps:$4 sm:$0xff]   ;;  %v2945_v13 = vld [vmem:[#allocation5 + $0x64] ss:$8 sps:$4 sm:$0xff]  }
  0xa2   : > { %v2947_v14 = vld [vmem:[#allocation5 + $0x60] ss:$8 sps:$4 sm:$0xff]   ;;  %v2948_v15 = vld [vmem:[#allocation5 + $0x74] ss:$8 sps:$4 sm:$0xff]   ;;  %v2951_v16 = vld [vmem:[#allocation7 + $0x4] ss:$8 sps:$4 sm:$0xff]  }
  0xa3   : > { %571 = vmatpush1.bf16.msra.mxu0 %v2932_v4  ;;  %v2953_v17 = vld [vmem:[#allocation7] ss:$8 sps:$4 sm:$0xff]   ;;  %v2954_v18 = vld [vmem:[#allocation7 + $0x14] ss:$8 sps:$4 sm:$0xff]   ;;  %v2950_v19 = vld [vmem:[#allocation5 + $0x70] ss:$8 sps:$4 sm:$0xff]   ;;  %1061 = vmatprep.subr.bf16.mxu1 %v2951_v16 }
  0xa4   : > { %572 = vmatprep.subr.bf16.mxu0 %v2933_v5  ;;  %v412_v20 = vld [vmem:[%s3701_s30] sm:$0xff]  ;;  %v413_v21 = vld [vmem:[%s3701_s30 + $0x8] sm:$0xff]  ;;  %1062 = vmatpush1.bf16.msra.mxu1 %v2953_v17  ;;  %v2956_v22 = vld [vmem:[#allocation7 + $0x10] ss:$8 sps:$4 sm:$0xff]   ;;  %s4250_s23 = scalar_lea.vmem [#allocation11], %s2595_s19  ;;  %s2704_s16 = sshll.u32 %s3493_s13, 12 }
  0xa5   : > { %v444_v23 = vpack.c.bf16 %v413_v21, %v412_v20  ;;  %1063 = vmatprep.subr.bf16.mxu1 %v2954_v18  ;;  %v2957_v24 = vld [vmem:[#allocation7 + $0x24] ss:$8 sps:$4 sm:$0xff]   ;;  %v2959_v25 = vld [vmem:[#allocation7 + $0x20] ss:$8 sps:$4 sm:$0xff]   ;;  %v2960_v26 = vld [vmem:[#allocation7 + $0x34] ss:$8 sps:$4 sm:$0xff]  }
  0xa6   : > { %v415_v28 = vld [vmem:[%s3701_s30 + $0x18] sm:$0xff]  ;;  %v2963_v31 = vld [vmem:[#allocation7 + $0x44] ss:$8 sps:$4 sm:$0xff]   ;;  %v2965_v32 = vld [vmem:[#allocation7 + $0x40] ss:$8 sps:$4 sm:$0xff]   ;;  %s2473_s24 = sshll.u32 %s4250_s23, 4  ;;  %s4319_s24 = int_to_ptr.vmem [resolvable:$true] %s2473_s24 }
  0xa7   : > { %573 = vmatpush1.bf16.msra.mxu0 %v2935_v6  ;;  %v2962_v29 = vld [vmem:[#allocation7 + $0x30] ss:$8 sps:$4 sm:$0xff]   ;;  %v445_v30 = vpack.c.bf16 %v415_v28, %v414_v27  ;;  %v2966_v33 = vld [vmem:[#allocation7 + $0x54] ss:$8 sps:$4 sm:$0xff]   ;;  %v416_v34 = vld [vmem:[%s3701_s30 + $0x20] sm:$0xff]  ;;  %s2460_s13 = scalar_lea.sflag [#allocation4], %s3695_s29 }
  0xa8   : > { %574 = vmatprep.subr.bf16.mxu0 %v2936_v7  ;;  %1064 = vmatpush1.bf16.msra.mxu1 %v2956_v22  ;;  %v417_v35 = vld [vmem:[%s3701_s30 + $0x28] sm:$0xff]  ;;  %v2968_v36 = vld [vmem:[#allocation7 + $0x50] ss:$8 sps:$4 sm:$0xff]   ;;  %v2972_v40 = vld [vmem:[#allocation7 + $0x74] ss:$8 sps:$4 sm:$0xff]   ;;  %s3333_s25 = scalar_lea.vmem %s4319_s24, 4096 }
  0xa9   : > { %1065 = vmatprep.subr.bf16.mxu1 %v2957_v24  ;;  %v2969_v37 = vld [vmem:[#allocation7 + $0x64] ss:$8 sps:$4 sm:$0xff]   ;;  %v446_v38 = vpack.c.bf16 %v417_v35, %v416_v34  ;;  %v2971_v39 = vld [vmem:[#allocation7 + $0x60] ss:$8 sps:$4 sm:$0xff]   ;;  %v418_v41 = vld [vmem:[%s3701_s30 + $0x30] sm:$0xff]  ;;  %p3334_p10 = scmp.ne.s32.totalorder %s4319_s24, %s3333_s25  ;;  %s3419_s26 = smov [#allocation11]  }
  0xaa   : > { %v419_v42 = vld [vmem:[%s3701_s30 + $0x38] sm:$0xff]  ;;  %v2975_v44 = vld [vmem:[#allocation7 + $0x84] ss:$8 sps:$4 sm:$0xff]   ;;  %v2977_v46 = vld [vmem:[#allocation7 + $0x80] ss:$8 sps:$4 sm:$0xff]   ;;  %s3337_s22 = sshll.u32 %s3419_s26, 4  ;;  %s3338_s22 = int_to_ptr.vmem [resolvable:$false] %s3337_s22 }
  0xab   : > { %575 = vmatpush1.bf16.msra.mxu0 %v2938_v8  ;;  %v2974_v43 = vld [vmem:[#allocation7 + $0x70] ss:$8 sps:$4 sm:$0xff]   ;;  %v447_v45 = vpack.c.bf16 %v419_v42, %v418_v41  ;;  %v2978_v47 = vld [vmem:[#allocation7 + $0x94] ss:$8 sps:$4 sm:$0xff]   ;;  %v420_v48 = vld [vmem:[%s3701_s30 + $0x40] sm:$0xff]  ;;  %p3335_p5 = pnand %p3334_p10, %p3643_p3  ;;  %s3339_s9 = scalar_lea.vmem %s3338_s22, 8192 }
  0xac   : > { %576 = vmatprep.subr.bf16.mxu0 %v2939_v9  ;;  %1066 = vmatpush1.bf16.msra.mxu1 %v2959_v25  ;;  %v421_v49 = vld [vmem:[%s3701_s30 + $0x48] sm:$0xff]  ;;  %v2980_v50 = vld [vmem:[#allocation7 + $0x90] ss:$8 sps:$4 sm:$0xff]   ;;  %v2984_v54 = vld [vmem:[#allocation7 + $0xb4] ss:$8 sps:$4 sm:$0xff]   ;;  %p3340_p12 = scmp.lt.s32.totalorder %s4319_s24, %s3338_s22  ;;  %p3341_p1 = scmp.lt.s32.totalorder %s3339_s9, %s3333_s25 }
  0xad   : > { %1067 = vmatprep.subr.bf16.mxu1 %v2960_v26  ;;  %v448_v51 = vpack.c.bf16 %v421_v49, %v420_v48  ;;  %v2981_v52 = vld [vmem:[#allocation7 + $0xa4] ss:$8 sps:$4 sm:$0xff]   ;;  %v2983_v53 = vld [vmem:[#allocation7 + $0xa0] ss:$8 sps:$4 sm:$0xff]   ;;  %v422_v55 = vld [vmem:[%s3701_s30 + $0x50] sm:$0xff]  ;;  %p3336_p7 = pneg %p3335_p5 }
  0xae   : > { %v423_v56 = vld [vmem:[%s3701_s30 + $0x58] sm:$0xff]  ;;  %v2987_v59 = vld [vmem:[#allocation7 + $0xc4] ss:$8 sps:$4 sm:$0xff]   ;;  %v2989_v60 = vld [vmem:[#allocation7 + $0xc0] ss:$8 sps:$4 sm:$0xff]   ;;  %p3342_p2 = por %p3341_p1, %p3340_p12 }
  0xaf   : > { %577 = vmatpush1.bf16.msra.mxu0 %v2941_v10  ;;  %v2986_v57 = vld [vmem:[#allocation7 + $0xb0] ss:$8 sps:$4 sm:$0xff]   ;;  %v449_v58 = vpack.c.bf16 %v423_v56, %v422_v55  ;;  %v2990_v61 = vld [vmem:[#allocation7 + $0xd4] ss:$8 sps:$4 sm:$0xff]   ;;  %v424_v62 = vld [vmem:[%s3701_s30 + $0x60] sm:$0xff] }
  0xb0   : > { %578 = vmatprep.subr.bf16.mxu0 %v2942_v11  ;;  %1068 = vmatpush1.bf16.msra.mxu1 %v2962_v29  ;;  %v425_v63 = vld [vmem:[%s3701_s30 + $0x68] sm:$0xff]  ;;  %v426_v2 = vld [vmem:[%s3701_s30 + $0x70] sm:$0xff]  ;;  %v427_v3 = vld [vmem:[%s3701_s30 + $0x78] sm:$0xff]  ;;  %p3343_p13 = pnand %p3342_p2, %p3336_p7 }
  0xb1   : > { %1069 = vmatprep.subr.bf16.mxu1 %v2963_v31  ;;  %v450_v1 = vpack.c.bf16 %v425_v63, %v424_v62  ;;  %v451_v4 = vpack.c.bf16 %v427_v3, %v426_v2  ;;  %v428_v5 = vld [vmem:[%s3701_s30 + $0x80] sm:$0xff]  ;;  %v429_v6 = vld [vmem:[%s3701_s30 + $0x88] sm:$0xff]  ;;  %v430_v8 = vld [vmem:[%s3701_s30 + $0x90] sm:$0xff] }
  0xb2   : > { %v452_v7 = vpack.c.bf16 %v429_v6, %v428_v5  ;;  %v431_v9 = vld [vmem:[%s3701_s30 + $0x98] sm:$0xff]  ;;  %v432_v11 = vld [vmem:[%s3701_s30 + $0xa0] sm:$0xff]  ;;  %v437_v22 = vld [vmem:[%s3701_s30 + $0xc8] sm:$0xff] }
  0xb3   : > { %579 = vmatpush1.bf16.msra.mxu0 %v2944_v12  ;;  %v453_v10 = vpack.c.bf16 %v431_v9, %v430_v8  ;;  %v433_v12 = vld [vmem:[%s3701_s30 + $0xa8] sm:$0xff]  ;;  %v2992_v16 = vld [vmem:[#allocation7 + $0xd0] ss:$8 sps:$4 sm:$0xff]   ;;  %v2996_v20 = vld [vmem:[#allocation7 + $0xf4] ss:$8 sps:$4 sm:$0xff]  }
  0xb4   : > { %580 = vmatprep.subr.bf16.mxu0 %v2945_v13  ;;  %1070 = vmatpush1.bf16.msra.mxu1 %v2965_v32  ;;  %v454_v13 = vpack.c.bf16 %v433_v12, %v432_v11  ;;  %v2993_v18 = vld [vmem:[#allocation7 + $0xe4] ss:$8 sps:$4 sm:$0xff]   ;;  %v438_v25 = vld [vmem:[%s3701_s30 + $0xd0] sm:$0xff]  ;;  %v439_v26 = vld [vmem:[%s3701_s30 + $0xd8] sm:$0xff] }
  0xb5   : > { %1071 = vmatprep.subr.bf16.mxu1 %v2966_v33  ;;  %v436_v21 = vld [vmem:[%s3701_s30 + $0xc0] sm:$0xff]  ;;  %v457_v27 = vpack.c.bf16 %v439_v26, %v438_v25  ;;  %v441_v29 = vld [vmem:[%s3701_s30 + $0xe8] sm:$0xff]  ;;  %v442_v31 = vld [vmem:[%s3701_s30 + $0xf0] sm:$0xff] }
  0xb6   : > { %v456_v24 = vpack.c.bf16 %v437_v22, %v436_v21  ;;  %v440_v28 = vld [vmem:[%s3701_s30 + $0xe0] sm:$0xff]  ;;  %v443_v32 = vld [vmem:[%s3701_s30 + $0xf8] sm:$0xff] }
  0xb7   : > { %581 = vmatpush1.bf16.msra.mxu0 %v2947_v14  ;;  %v434_v14 = vld [vmem:[%s3701_s30 + $0xb0] sm:$0xff]  ;;  %v459_v33 = vpack.c.bf16 %v443_v32, %v442_v31  ;;  %v2999_v34 = vld [vmem:[#allocation8] ss:$8 sps:$4 sm:$0xff]   ;;  %v3001_v35 = vld [vmem:[#allocation8 + $0x4] ss:$8 sps:$4 sm:$0xff]  }
  0xb8   : > { %582 = vmatprep.subr.bf16.mxu0 %v2948_v15  ;;  %1072 = vmatpush1.bf16.msra.mxu1 %v2968_v36  ;;  %v435_v15 = vld [vmem:[%s3701_s30 + $0xb8] sm:$0xff]  ;;  %v478_v36 = vlaneseq  ;;  %v3005_v42 = vld [vmem:[#allocation8 + $0x20] ss:$8 sps:$4 sm:$0xff]   ;;  %v3013_v56 = vld [vmem:[#allocation8 + $0x44] ss:$8 sps:$4 sm:$0xff]   ;;  %s4399_s30 = sld [smem:[#allocation18_spill]] }
  0xb9   : > { %1073 = vmatprep.subr.bf16.mxu1 %v2969_v37  ;;  %v455_v17 = vpack.c.bf16 %v435_v15, %v434_v14  ;;  %v3002_v37 = vld [vmem:[#allocation8 + $0x10] ss:$8 sps:$4 sm:$0xff]   ;;  %v3010_v48 = vld [vmem:[#allocation8 + $0x34] ss:$8 sps:$4 sm:$0xff]   ;;  %v3011_v55 = vld [vmem:[#allocation8 + $0x40] ss:$8 sps:$4 sm:$0xff]  }
  0xba   : > { %v3017_v11 = vld [vmem:[#allocation8 + $0x60] ss:$8 sps:$4 sm:$0xff]   ;;  %v3025_v22 = vld [vmem:[#allocation8 + $0x84] ss:$8 sps:$4 sm:$0xff]   ;;  %v3028_v31 = vld [vmem:[#allocation8 + $0x94] ss:$8 sps:$4 sm:$0xff]  }
  0xbb   : > { %583 = vmatpush1.bf16.msra.mxu0 %v2950_v19  ;;  %v2995_v19 = vld [vmem:[#allocation7 + $0xe0] ss:$8 sps:$4 sm:$0xff]  }
  0xbc   : > { %1074 = vmatpush1.bf16.msra.mxu1 %v2971_v39  ;;  %1554 = vmatprep.subr.bf16.mxu0 %v3001_v35  ;;  %v479_v39 = vshrl.u32 %v478_v36, 7 }
  0xbd   : > { %1075 = vmatprep.subr.bf16.mxu1 %v2972_v40 }
  0xbe   : > { %601 = vmatmul.mubr.bf16.vlgmr.msra.gmra.mrb[0].mxu0 %v444_v23  ;;  %v2998_v23 = vld [vmem:[#allocation7 + $0xf0] ss:$8 sps:$4 sm:$0xff]   ;;  %v3763_v40 = vsub.s32 0, %v479_v39  ;;  %v3768_v41 = vsub.s32 1, %v479_v39  ;;  %s4400_s15 = smov %s4399_s30  ;;  %s4317_s17 = scalar_lea.hbm %s4399_s30, %s2704_s16 }
  0xbf   : > { %610 = vmatprep.mubr.bf16.mxu0 %v3418_v0  ;;  %1555 = vmatpush1.bf16.msra.mxu0 %v2999_v34 }
  0xc0   : > { %1076 = vmatpush1.bf16.msra.mxu1 %v2974_v43  ;;  %v3007_v43 = vld [vmem:[#allocation8 + $0x24] ss:$8 sps:$4 sm:$0xff]  }
  0xc1   : > { %1077 = vmatprep.subr.bf16.mxu1 %v2975_v44 }
  0xc4   : > { %1078 = vmatpush1.bf16.msra.mxu1 %v2977_v46 }
  0xc5   : > { %1079 = vmatprep.subr.bf16.mxu1 %v2978_v47  ;;  %v3008_v47 = vld [vmem:[#allocation8 + $0x30] ss:$8 sps:$4 sm:$0xff]  }
  0xc6   : > { %611 = vmatmul.mubr.bf16.gmra.mrb[4].mxu0 %v445_v30  ;;  %v458_v30 = vpack.c.bf16 %v441_v29, %v440_v28  ;;  %v3023_v29 = vld [vmem:[#allocation8 + $0x80] ss:$8 sps:$4 sm:$0xff]  }
  0xc7   : > { %620 = vmatprep.mubr.bf16.mxu0 %v3418_v0 }
  0xc8   : > { %1080 = vmatpush1.bf16.msra.mxu1 %v2980_v50 }
  0xc9   : > { %1081 = vmatprep.subr.bf16.mxu1 %v2981_v52 }
  0xcc   : > { %1082 = vmatpush1.bf16.msra.mxu1 %v2983_v53 }
  0xcd   : > { %1083 = vmatprep.subr.bf16.mxu1 %v2984_v54 }
  0xce   : > { %621 = vmatmul.mubr.bf16.gmra.mrb[8].mxu0 %v446_v38  ;;  %v3004_v38 = vld [vmem:[#allocation8 + $0x14] ss:$8 sps:$4 sm:$0xff]  }
  0xcf   : > { %630 = vmatprep.mubr.bf16.mxu0 %v3418_v0  ;;  %1556 = vmatprep.subr.bf16.mxu0 %v3004_v38 }
  0xd0   : > { %1084 = vmatpush1.bf16.msra.mxu1 %v2986_v57  ;;  %1557 = vmatpush1.bf16.msra.mxu0 %v3002_v37  ;;  %v3026_v37 = vld [vmem:[#allocation8 + $0x90] ss:$8 sps:$4 sm:$0xff]  }
  0xd1   : > { %1085 = vmatprep.subr.bf16.mxu1 %v2987_v59  ;;  %1558 = vmatprep.subr.bf16.mxu0 %v3007_v43 }
  0xd4   : > { %1086 = vmatpush1.bf16.msra.mxu1 %v2989_v60  ;;  %1559 = vmatpush1.bf16.msra.mxu0 %v3005_v42 }
  0xd5   : > { %1087 = vmatprep.subr.bf16.mxu1 %v2990_v61  ;;  %1560 = vmatprep.subr.bf16.mxu0 %v3010_v48 }
  0xd6   : > { %631 = vmatmul.mubr.bf16.gmra.mrb[12].mxu0 %v447_v45 }
  0xd7   : > { %640 = vmatprep.mubr.bf16.mxu0 %v3418_v0 }
  0xd8   : > { %1088 = vmatpush1.bf16.msra.mxu1 %v2992_v16  ;;  %1561 = vmatpush1.bf16.msra.mxu0 %v3008_v47 }
  0xd9   : > { %1089 = vmatprep.subr.bf16.mxu1 %v2993_v18  ;;  %1562 = vmatprep.subr.bf16.mxu0 %v3013_v56 }
  0xdc   : > { %1090 = vmatpush1.bf16.msra.mxu1 %v2995_v19  ;;  %1563 = vmatpush1.bf16.msra.mxu0 %v3011_v55  ;;  %v3020_v19 = vld [vmem:[#allocation8 + $0x70] ss:$8 sps:$4 sm:$0xff]  }
  0xdd   : > { %1091 = vmatprep.subr.bf16.mxu1 %v2996_v20 }
  0xde   : > { %641 = vmatmul.mubr.bf16.gmra.mrb[16].mxu0 %v448_v51 }
  0xdf   : > { %650 = vmatprep.mubr.bf16.mxu0 %v3418_v0 }
  0xe0   : > { %1092 = vmatpush1.bf16.msra.mxu1 %v2998_v23 }
  0xe6   : > { %651 = vmatmul.mubr.bf16.gmra.mrb[20].mxu0 %v449_v58  ;;  %v3016_v58 = vld [vmem:[#allocation8 + $0x54] ss:$8 sps:$4 sm:$0xff]  }
  0xe7   : > { %660 = vmatprep.mubr.bf16.mxu0 %v3418_v0  ;;  %1564 = vmatprep.subr.bf16.mxu0 %v3016_v58  ;;  %v3032_v58 = vld [vmem:[#allocation8 + $0xb0] ss:$8 sps:$4 sm:$0xff]  }
  0xee   : > { %661 = vmatmul.mubr.bf16.gmra.mrb[24].mxu0 %v450_v1  ;;  %v3014_v1 = vld [vmem:[#allocation8 + $0x50] ss:$8 sps:$4 sm:$0xff]  }
  0xef   : > { %670 = vmatprep.mubr.bf16.mxu0 %v3418_v0  ;;  %1565 = vmatpush1.bf16.msra.mxu0 %v3014_v1 }
  0xf6   : > { %671 = vmatmul.mubr.bf16.gmra.mrb[28].mxu0 %v451_v4  ;;  %v3019_v4 = vld [vmem:[#allocation8 + $0x64] ss:$8 sps:$4 sm:$0xff]  }
  0xf7   : > { %680 = vmatprep.mubr.bf16.mxu0 %v3418_v0  ;;  %1566 = vmatprep.subr.bf16.mxu0 %v3019_v4 }
  0xf8   : > { %1567 = vmatpush1.bf16.msra.mxu0 %v3017_v11 }
  0xfe   : > { %681 = vmatmul.mubr.bf16.gmra.mrb[32].mxu0 %v452_v7 }
  0xff   : > { %690 = vmatprep.mubr.bf16.mxu0 %v3418_v0 }
 0x106   : > { %691 = vmatmul.mubr.bf16.gmra.mrb[36].mxu0 %v453_v10 }
 0x107   : > { %700 = vmatprep.mubr.bf16.mxu0 %v3418_v0 }
 0x10e   : > { %701 = vmatmul.mubr.bf16.gmra.mrb[40].mxu0 %v454_v13  ;;  %v3022_v13 = vld [vmem:[#allocation8 + $0x74] ss:$8 sps:$4 sm:$0xff]  }
 0x10f   : > { %710 = vmatprep.mubr.bf16.mxu0 %v3418_v0  ;;  %1568 = vmatprep.subr.bf16.mxu0 %v3022_v13  ;;  %v3038_v13 = vld [vmem:[#allocation8 + $0xd0] ss:$8 sps:$4 sm:$0xff]  }
 0x110   : > { %1569 = vmatpush1.bf16.msra.mxu0 %v3020_v19 }
 0x111   : > { %1570 = vmatprep.subr.bf16.mxu0 %v3025_v22 }
 0x114   : > { %1571 = vmatpush1.bf16.msra.mxu0 %v3023_v29 }
 0x115   : > { %1572 = vmatprep.subr.bf16.mxu0 %v3028_v31 }
 0x116   : > { %711 = vmatmul.mubr.bf16.gmra.mrb[44].mxu0 %v455_v17 }
 0x117   : > { %720 = vmatprep.mubr.bf16.mxu0 %v3418_v0 }
 0x118   : > { %1573 = vmatpush1.bf16.msra.mxu0 %v3026_v37 }
 0x11e   : > { %721 = vmatmul.mubr.bf16.gmra.mrb[48].mxu0 %v456_v24 }
 0x11f   : > { %730 = vmatprep.mubr.bf16.mxu0 %v3418_v0 }
 0x126   : > { %731 = vmatmul.mubr.bf16.gmra.mrb[52].mxu0 %v457_v27 }
 0x127   : > { %740 = vmatprep.mubr.bf16.mxu0 %v3418_v0 }
 0x12e   : > { %741 = vmatmul.mubr.bf16.gmra.mrb[56].mxu0 %v458_v30 }
 0x12f   : > { %750 = vmatprep.mubr.bf16.mxu0 %v3418_v0  ;;  %v476_v0 = vld [vmem:[%s4368_s2] sm:$0x3] }
 0x130   : > { %v3771_v44 = vrot.slane %v476_v0, %v3763_v40  ;;  %v3774_v45 = vrot.slane %v476_v0, %v3768_v41  ;;  %v3031_v0 = vld [vmem:[#allocation8 + $0xa4] ss:$8 sps:$4 sm:$0xff]  }
 0x131   : > { %1574 = vmatprep.subr.bf16.mxu0 %v3031_v0 }
 0x136   : > { %751 = vmatmul.mubr.bf16.gmra.mrb[60].mxu0 %v459_v33 }
 0x191   : > { %v602_v46 = vpop.f32.mrb[0].mxu0 }
 0x192   : > { %v603_v49 = vadd.f32 %v602_v46, %v3771_v44  ;;  %v604_v50 = vpop.f32.mrb[1].mxu0 }
 0x193   : > { %v605_v51 = vadd.f32 %v604_v50, %v3774_v45  ;;  %v606_v52 = vpop.f32.mrb[2].mxu0  ;;  %v3029_v50 = vld [vmem:[#allocation8 + $0xa0] ss:$8 sps:$4 sm:$0xff]  }
 0x194   : > { %v607_v53 = vadd.f32 %v606_v52, %v3771_v44  ;;  %v608_v54 = vpop.f32.mrb[3].mxu0  ;;  %v761_v59 = vmax.f32 %v603_v49, 0.0  ;;  %v3034_v52 = vld [vmem:[#allocation8 + $0xb4] ss:$8 sps:$4 sm:$0xff]   ;;  %1575 = vmatpush1.bf16.msra.mxu0 %v3029_v50 }
 0x195   : > { %v609_v57 = vadd.f32 %v608_v54, %v3774_v45  ;;  %v762_v61 = vmax.f32 %v605_v51, 0.0  ;;  %1576 = vmatprep.subr.bf16.mxu0 %v3034_v52 }
 0x196   : > { %v763_v60 = vmax.f32 %v607_v53, 0.0 }
 0x197   : > { %v764_v62 = vmax.f32 %v609_v57, 0.0 }
 0x198   : > { %v825_v63 = vpack.c.bf16 %v763_v60, %v761_v59  ;;  %1577 = vmatpush1.bf16.msra.mxu0 %v3032_v58 }
 0x199   : > { %v612_v2 = vpop.f32.mrb[4].mxu0  ;;  %v826_v3 = vpack.c.bf16 %v764_v62, %v762_v61  ;;  %v3037_v61 = vld [vmem:[#allocation8 + $0xc4] ss:$8 sps:$4 sm:$0xff]  }
 0x19a   : > { %v613_v5 = vadd.f32 %v612_v2, %v3771_v44  ;;  %v614_v6 = vpop.f32.mrb[5].mxu0  ;;  %1578 = vmatprep.subr.bf16.mxu0 %v3037_v61 }
 0x19b   : > { %v615_v7 = vadd.f32 %v614_v6, %v3774_v45  ;;  %v616_v8 = vpop.f32.mrb[6].mxu0  ;;  %1093 = vmatprep.mubr.bf16.mxu1 %v826_v3 }
 0x19c   : > { %v617_v9 = vadd.f32 %v616_v8, %v3771_v44  ;;  %v618_v10 = vpop.f32.mrb[7].mxu0  ;;  %1094 = vmatmul.mubr.bf16.vlgmr.msra.gmra.mrb[0].mxu1 %v825_v63  ;;  %v765_v14 = vmax.f32 %v613_v5, 0.0  ;;  %v3035_v5 = vld [vmem:[#allocation8 + $0xc0] ss:$8 sps:$4 sm:$0xff]  }
 0x19d   : > { %v619_v12 = vadd.f32 %v618_v10, %v3774_v45  ;;  %v766_v16 = vmax.f32 %v615_v7, 0.0  ;;  %v3040_v7 = vld [vmem:[#allocation8 + $0xd4] ss:$8 sps:$4 sm:$0xff]   ;;  %1579 = vmatpush1.bf16.msra.mxu0 %v3035_v5 }
 0x19e   : > { %v767_v15 = vmax.f32 %v617_v9, 0.0  ;;  %1580 = vmatprep.subr.bf16.mxu0 %v3040_v7 }
 0x19f   : > { %v768_v17 = vmax.f32 %v619_v12, 0.0 }
 0x1a0   : > { %v827_v18 = vpack.c.bf16 %v767_v15, %v765_v14 }
 0x1a1   : > { %v828_v20 = vpack.c.bf16 %v768_v17, %v766_v16  ;;  %v622_v21 = vpop.f32.mrb[8].mxu0  ;;  %v3043_v16 = vld [vmem:[#allocation8 + $0xe4] ss:$8 sps:$4 sm:$0xff]   ;;  %1581 = vmatpush1.bf16.msra.mxu0 %v3038_v13 }
 0x1a2   : > { %v623_v23 = vadd.f32 %v622_v21, %v3771_v44  ;;  %v624_v24 = vpop.f32.mrb[9].mxu0  ;;  %1582 = vmatprep.subr.bf16.mxu0 %v3043_v16 }
 0x1a3   : > { %v625_v25 = vadd.f32 %v624_v24, %v3774_v45  ;;  %v626_v26 = vpop.f32.mrb[10].mxu0  ;;  %1103 = vmatprep.mubr.bf16.mxu1 %v828_v20 }
 0x1a4   : > { %v627_v27 = vadd.f32 %v626_v26, %v3771_v44  ;;  %v628_v28 = vpop.f32.mrb[11].mxu0  ;;  %1104 = vmatmul.mubr.bf16.gmra.mrb[4].mxu1 %v827_v18  ;;  %v769_v32 = vmax.f32 %v623_v23, 0.0  ;;  %v3041_v23 = vld [vmem:[#allocation8 + $0xe0] ss:$8 sps:$4 sm:$0xff]  }
 0x1a5   : > { %v629_v30 = vadd.f32 %v628_v28, %v3774_v45  ;;  %v770_v34 = vmax.f32 %v625_v25, 0.0  ;;  %1583 = vmatpush1.bf16.msra.mxu0 %v3041_v23 }
 0x1a6   : > { %v771_v33 = vmax.f32 %v627_v27, 0.0 }
 0x1a7   : > { %v772_v35 = vmax.f32 %v629_v30, 0.0 }
 0x1a8   : > { %v829_v36 = vpack.c.bf16 %v771_v33, %v769_v32 }
 0x1a9   : > { %v830_v38 = vpack.c.bf16 %v772_v35, %v770_v34  ;;  %v632_v39 = vpop.f32.mrb[12].mxu0 }
 0x1aa   : > { %v633_v42 = vadd.f32 %v632_v39, %v3771_v44  ;;  %v634_v43 = vpop.f32.mrb[13].mxu0 }
 0x1ab   : > { %v635_v46 = vadd.f32 %v634_v43, %v3774_v45  ;;  %v636_v47 = vpop.f32.mrb[14].mxu0  ;;  %1113 = vmatprep.mubr.bf16.mxu1 %v830_v38 }
 0x1ac   : > { %v637_v48 = vadd.f32 %v636_v47, %v3771_v44  ;;  %v638_v49 = vpop.f32.mrb[15].mxu0  ;;  %1114 = vmatmul.mubr.bf16.gmra.mrb[8].mxu1 %v829_v36  ;;  %v773_v53 = vmax.f32 %v633_v42, 0.0 }
 0x1ad   : > { %v639_v51 = vadd.f32 %v638_v49, %v3774_v45  ;;  %v774_v55 = vmax.f32 %v635_v46, 0.0 }
 0x1ae   : > { %v775_v54 = vmax.f32 %v637_v48, 0.0 }
 0x1af   : > { %v776_v56 = vmax.f32 %v639_v51, 0.0 }
 0x1b0   : > { %v831_v57 = vpack.c.bf16 %v775_v54, %v773_v53 }
 0x1b1   : > { %v832_v59 = vpack.c.bf16 %v776_v56, %v774_v55  ;;  %v642_v60 = vpop.f32.mrb[16].mxu0 }
 0x1b2   : > { %v643_v62 = vadd.f32 %v642_v60, %v3771_v44  ;;  %v644_v63 = vpop.f32.mrb[17].mxu0 }
 0x1b3   : > { %v645_v1 = vadd.f32 %v644_v63, %v3774_v45  ;;  %v646_v2 = vpop.f32.mrb[18].mxu0  ;;  %1123 = vmatprep.mubr.bf16.mxu1 %v832_v59 }
 0x1b4   : > { %v647_v3 = vadd.f32 %v646_v2, %v3771_v44  ;;  %v648_v4 = vpop.f32.mrb[19].mxu0  ;;  %1124 = vmatmul.mubr.bf16.gmra.mrb[12].mxu1 %v831_v57  ;;  %v777_v8 = vmax.f32 %v643_v62, 0.0 }
 0x1b5   : > { %v649_v6 = vadd.f32 %v648_v4, %v3774_v45  ;;  %v778_v10 = vmax.f32 %v645_v1, 0.0 }
 0x1b6   : > { %v779_v9 = vmax.f32 %v647_v3, 0.0 }
 0x1b7   : > { %v780_v11 = vmax.f32 %v649_v6, 0.0 }
 0x1b8   : > { %v833_v12 = vpack.c.bf16 %v779_v9, %v777_v8 }
 0x1b9   : > { %v834_v14 = vpack.c.bf16 %v780_v11, %v778_v10  ;;  %v652_v15 = vpop.f32.mrb[20].mxu0 }
 0x1ba   : > { %v653_v17 = vadd.f32 %v652_v15, %v3771_v44  ;;  %v654_v18 = vpop.f32.mrb[21].mxu0 }
 0x1bb   : > { %v655_v19 = vadd.f32 %v654_v18, %v3774_v45  ;;  %v656_v20 = vpop.f32.mrb[22].mxu0  ;;  %1133 = vmatprep.mubr.bf16.mxu1 %v834_v14 }
 0x1bc   : > { %v657_v21 = vadd.f32 %v656_v20, %v3771_v44  ;;  %v658_v22 = vpop.f32.mrb[23].mxu0  ;;  %1134 = vmatmul.mubr.bf16.gmra.mrb[16].mxu1 %v833_v12  ;;  %v781_v25 = vmax.f32 %v653_v17, 0.0 }
 0x1bd   : > { %v659_v24 = vadd.f32 %v658_v22, %v3774_v45  ;;  %v782_v27 = vmax.f32 %v655_v19, 0.0 }
 0x1be   : > { %v783_v26 = vmax.f32 %v657_v21, 0.0 }
 0x1bf   : > { %v784_v28 = vmax.f32 %v659_v24, 0.0 }
 0x1c0   : > { %v835_v29 = vpack.c.bf16 %v783_v26, %v781_v25 }
 0x1c1   : > { %v836_v30 = vpack.c.bf16 %v784_v28, %v782_v27  ;;  %v662_v31 = vpop.f32.mrb[24].mxu0 }
 0x1c2   : > { %v663_v32 = vadd.f32 %v662_v31, %v3771_v44  ;;  %v664_v33 = vpop.f32.mrb[25].mxu0 }
 0x1c3   : > { %v665_v34 = vadd.f32 %v664_v33, %v3774_v45  ;;  %v666_v35 = vpop.f32.mrb[26].mxu0  ;;  %1143 = vmatprep.mubr.bf16.mxu1 %v836_v30 }
 0x1c4   : > { %v667_v36 = vadd.f32 %v666_v35, %v3771_v44  ;;  %v668_v37 = vpop.f32.mrb[27].mxu0  ;;  %1144 = vmatmul.mubr.bf16.gmra.mrb[20].mxu1 %v835_v29  ;;  %v785_v39 = vmax.f32 %v663_v32, 0.0 }
 0x1c5   : > { %v669_v38 = vadd.f32 %v668_v37, %v3774_v45  ;;  %v786_v42 = vmax.f32 %v665_v34, 0.0 }
 0x1c6   : > { %v787_v0 = vmax.f32 %v667_v36, 0.0 }
 0x1c7   : > { %v788_v43 = vmax.f32 %v669_v38, 0.0 }
 0x1c8   : > { %v837_v46 = vpack.c.bf16 %v787_v0, %v785_v39 }
 0x1c9   : > { %v838_v47 = vpack.c.bf16 %v788_v43, %v786_v42  ;;  %v672_v48 = vpop.f32.mrb[28].mxu0 }
 0x1ca   : > { %v673_v49 = vadd.f32 %v672_v48, %v3771_v44  ;;  %v674_v50 = vpop.f32.mrb[29].mxu0 }
 0x1cb   : > { %v675_v51 = vadd.f32 %v674_v50, %v3774_v45  ;;  %v676_v52 = vpop.f32.mrb[30].mxu0  ;;  %1153 = vmatprep.mubr.bf16.mxu1 %v838_v47 }
 0x1cc   : > { %v677_v53 = vadd.f32 %v676_v52, %v3771_v44  ;;  %v678_v54 = vpop.f32.mrb[31].mxu0  ;;  %1154 = vmatmul.mubr.bf16.gmra.mrb[24].mxu1 %v837_v46  ;;  %v789_v56 = vmax.f32 %v673_v49, 0.0 }
 0x1cd   : > { %v679_v55 = vadd.f32 %v678_v54, %v3774_v45  ;;  %v790_v58 = vmax.f32 %v675_v51, 0.0 }
 0x1ce   : > { %v791_v57 = vmax.f32 %v677_v53, 0.0 }
 0x1cf   : > { %v792_v59 = vmax.f32 %v679_v55, 0.0 }
 0x1d0   : > { %v839_v60 = vpack.c.bf16 %v791_v57, %v789_v56 }
 0x1d1   : > { %v840_v61 = vpack.c.bf16 %v792_v59, %v790_v58  ;;  %v682_v62 = vpop.f32.mrb[32].mxu0 }
 0x1d2   : > { %v683_v63 = vadd.f32 %v682_v62, %v3771_v44  ;;  %v684_v1 = vpop.f32.mrb[33].mxu0 }
 0x1d3   : > { %v685_v2 = vadd.f32 %v684_v1, %v3774_v45  ;;  %v686_v3 = vpop.f32.mrb[34].mxu0  ;;  %1163 = vmatprep.mubr.bf16.mxu1 %v840_v61 }
 0x1d4   : > { %v687_v4 = vadd.f32 %v686_v3, %v3771_v44  ;;  %v688_v5 = vpop.f32.mrb[35].mxu0  ;;  %1164 = vmatmul.mubr.bf16.gmra.mrb[28].mxu1 %v839_v60  ;;  %v793_v7 = vmax.f32 %v683_v63, 0.0 }
 0x1d5   : > { %v689_v6 = vadd.f32 %v688_v5, %v3774_v45  ;;  %v794_v9 = vmax.f32 %v685_v2, 0.0  ;;  %v3046_v2 = vld [vmem:[#allocation8 + $0xf4] ss:$8 sps:$4 sm:$0xff]  }
 0x1d6   : > { %v795_v8 = vmax.f32 %v687_v4, 0.0  ;;  %v3044_v4 = vld [vmem:[#allocation8 + $0xf0] ss:$8 sps:$4 sm:$0xff]   ;;  %1584 = vmatprep.subr.bf16.mxu0 %v3046_v2 }
 0x1d7   : > { %v796_v10 = vmax.f32 %v689_v6, 0.0  ;;  %1585 = vmatpush1.bf16.msra.mxu0 %v3044_v4 }
 0x1d8   : > { %v841_v11 = vpack.c.bf16 %v795_v8, %v793_v7 }
 0x1d9   : > { %v842_v12 = vpack.c.bf16 %v796_v10, %v794_v9  ;;  %v692_v13 = vpop.f32.mrb[36].mxu0 }
 0x1da   : > { %v693_v14 = vadd.f32 %v692_v13, %v3771_v44  ;;  %v694_v15 = vpop.f32.mrb[37].mxu0 }
 0x1db   : > { %v695_v16 = vadd.f32 %v694_v15, %v3774_v45  ;;  %v696_v17 = vpop.f32.mrb[38].mxu0  ;;  %1173 = vmatprep.mubr.bf16.mxu1 %v842_v12 }
 0x1dc   : > { %v697_v18 = vadd.f32 %v696_v17, %v3771_v44  ;;  %v698_v19 = vpop.f32.mrb[39].mxu0  ;;  %1174 = vmatmul.mubr.bf16.gmra.mrb[32].mxu1 %v841_v11  ;;  %v797_v21 = vmax.f32 %v693_v14, 0.0 }
 0x1dd   : > { %v699_v20 = vadd.f32 %v698_v19, %v3774_v45  ;;  %v798_v23 = vmax.f32 %v695_v16, 0.0 }
 0x1de   : > { %v799_v22 = vmax.f32 %v697_v18, 0.0 }
 0x1df   : > { %v800_v24 = vmax.f32 %v699_v20, 0.0 }
 0x1e0   : > { %v843_v25 = vpack.c.bf16 %v799_v22, %v797_v21 }
 0x1e1   : > { %v844_v26 = vpack.c.bf16 %v800_v24, %v798_v23  ;;  %v702_v27 = vpop.f32.mrb[40].mxu0 }
 0x1e2   : > { %v703_v28 = vadd.f32 %v702_v27, %v3771_v44  ;;  %v704_v29 = vpop.f32.mrb[41].mxu0 }
 0x1e3   : > { %v705_v30 = vadd.f32 %v704_v29, %v3774_v45  ;;  %v706_v31 = vpop.f32.mrb[42].mxu0  ;;  %1183 = vmatprep.mubr.bf16.mxu1 %v844_v26 }
 0x1e4   : > { %v707_v32 = vadd.f32 %v706_v31, %v3771_v44  ;;  %v708_v33 = vpop.f32.mrb[43].mxu0  ;;  %1184 = vmatmul.mubr.bf16.gmra.mrb[36].mxu1 %v843_v25  ;;  %v801_v35 = vmax.f32 %v703_v28, 0.0 }
 0x1e5   : > { %v709_v34 = vadd.f32 %v708_v33, %v3774_v45  ;;  %v802_v37 = vmax.f32 %v705_v30, 0.0 }
 0x1e6   : > { %v803_v36 = vmax.f32 %v707_v32, 0.0 }
 0x1e7   : > { %v804_v38 = vmax.f32 %v709_v34, 0.0 }
 0x1e8   : > { %v845_v39 = vpack.c.bf16 %v803_v36, %v801_v35 }
 0x1e9   : > { %v846_v0 = vpack.c.bf16 %v804_v38, %v802_v37  ;;  %v712_v42 = vpop.f32.mrb[44].mxu0 }
 0x1ea   : > { %v713_v43 = vadd.f32 %v712_v42, %v3771_v44  ;;  %v714_v46 = vpop.f32.mrb[45].mxu0 }
 0x1eb   : > { %v715_v47 = vadd.f32 %v714_v46, %v3774_v45  ;;  %v716_v48 = vpop.f32.mrb[46].mxu0  ;;  %1193 = vmatprep.mubr.bf16.mxu1 %v846_v0 }
 0x1ec   : > { %v717_v49 = vadd.f32 %v716_v48, %v3771_v44  ;;  %v718_v50 = vpop.f32.mrb[47].mxu0  ;;  %1194 = vmatmul.mubr.bf16.gmra.mrb[40].mxu1 %v845_v39  ;;  %v805_v52 = vmax.f32 %v713_v43, 0.0 }
 0x1ed   : > { %v719_v51 = vadd.f32 %v718_v50, %v3774_v45  ;;  %v806_v54 = vmax.f32 %v715_v47, 0.0 }
 0x1ee   : > { %v807_v53 = vmax.f32 %v717_v49, 0.0 }
 0x1ef   : > { %v808_v55 = vmax.f32 %v719_v51, 0.0 }
 0x1f0   : > { %v847_v56 = vpack.c.bf16 %v807_v53, %v805_v52 }
 0x1f1   : > { %v848_v57 = vpack.c.bf16 %v808_v55, %v806_v54  ;;  %v722_v58 = vpop.f32.mrb[48].mxu0 }
 0x1f2   : > { %v723_v59 = vadd.f32 %v722_v58, %v3771_v44  ;;  %v724_v60 = vpop.f32.mrb[49].mxu0  ;;  %v3048_v58 = vld [vmem:[#allocation10] sm:$0xff]  }
 0x1f3   : > { %v725_v61 = vadd.f32 %v724_v60, %v3774_v45  ;;  %v726_v62 = vpop.f32.mrb[50].mxu0  ;;  %1203 = vmatprep.mubr.bf16.mxu1 %v848_v57  ;;  %v3047_v57 = vld [vmem:[#allocation10 + $0x40] sm:$0xff]  }
 0x1f4   : > { %v727_v63 = vadd.f32 %v726_v62, %v3771_v44  ;;  %v728_v1 = vpop.f32.mrb[51].mxu0  ;;  %1204 = vmatmul.mubr.bf16.gmra.mrb[44].mxu1 %v847_v56  ;;  %v809_v5 = vmax.f32 %v723_v59, 0.0  ;;  %v889_v56 = vld [vmem:[%s4370_s4] sm:$0x3]  ;;  %2817 = vmatprep.subr.bf16.mxu1 %v3047_v57 }
 0x1f5   : > { %v729_v3 = vadd.f32 %v728_v1, %v3774_v45  ;;  %v810_v7 = vmax.f32 %v725_v61, 0.0  ;;  %2705 = vmatprep.subr.bf16.mxu0 %v3047_v57  ;;  %2825 = vmatpush3.bf16.msra.mxu1 %v3048_v58 }
 0x1f6   : > { %v811_v6 = vmax.f32 %v727_v63, 0.0 }
 0x1f7   : > { %v812_v8 = vmax.f32 %v729_v3, 0.0  ;;  %v3049_v3 = vld [vmem:[#allocation10 + $0x48] sm:$0xff]  }
 0x1f8   : > { %v849_v9 = vpack.c.bf16 %v811_v6, %v809_v5  ;;  %v3050_v5 = vld [vmem:[#allocation10 + $0x8] sm:$0xff]   ;;  %2818 = vmatprep.subr.bf16.mxu1 %v3049_v3 }
 0x1f9   : > { %v850_v10 = vpack.c.bf16 %v812_v8, %v810_v7  ;;  %v732_v11 = vpop.f32.mrb[52].mxu0  ;;  %v3051_v8 = vld [vmem:[#allocation10 + $0x50] sm:$0xff]   ;;  %2826 = vmatpush3.bf16.msra.mxu1 %v3050_v5 }
 0x1fa   : > { %v733_v12 = vadd.f32 %v732_v11, %v3771_v44  ;;  %v734_v13 = vpop.f32.mrb[53].mxu0  ;;  %2819 = vmatprep.subr.bf16.mxu1 %v3051_v8 }
 0x1fb   : > { %v735_v14 = vadd.f32 %v734_v13, %v3774_v45  ;;  %v736_v15 = vpop.f32.mrb[54].mxu0  ;;  %1213 = vmatprep.mubr.bf16.mxu1 %v850_v10 }
 0x1fc   : > { %v737_v16 = vadd.f32 %v736_v15, %v3771_v44  ;;  %v738_v17 = vpop.f32.mrb[55].mxu0  ;;  %1214 = vmatmul.mubr.bf16.gmra.mrb[48].mxu1 %v849_v9  ;;  %v813_v19 = vmax.f32 %v733_v12, 0.0 }
 0x1fd   : > { %v739_v18 = vadd.f32 %v738_v17, %v3774_v45  ;;  %v814_v21 = vmax.f32 %v735_v14, 0.0  ;;  %v3052_v14 = vld [vmem:[#allocation10 + $0x10] sm:$0xff]   ;;  %v3053_v17 = vld [vmem:[#allocation10 + $0x58] sm:$0xff]  }
 0x1fe   : > { %v815_v20 = vmax.f32 %v737_v16, 0.0  ;;  %2827 = vmatpush3.bf16.msra.mxu1 %v3052_v14 }
 0x1ff   : > { %v816_v22 = vmax.f32 %v739_v18, 0.0  ;;  %2820 = vmatprep.subr.bf16.mxu1 %v3053_v17 }
 0x200   : > { %v851_v23 = vpack.c.bf16 %v815_v20, %v813_v19 }
 0x201   : > { %v852_v24 = vpack.c.bf16 %v816_v22, %v814_v21  ;;  %v742_v25 = vpop.f32.mrb[56].mxu0 }
 0x202   : > { %v743_v26 = vadd.f32 %v742_v25, %v3771_v44  ;;  %v744_v27 = vpop.f32.mrb[57].mxu0 }
 0x203   : > { %v745_v28 = vadd.f32 %v744_v27, %v3774_v45  ;;  %v746_v29 = vpop.f32.mrb[58].mxu0  ;;  %1223 = vmatprep.mubr.bf16.mxu1 %v852_v24 }
 0x204   : > { %v747_v30 = vadd.f32 %v746_v29, %v3771_v44  ;;  %v748_v31 = vpop.f32.mrb[59].mxu0  ;;  %1224 = vmatmul.mubr.bf16.gmra.mrb[52].mxu1 %v851_v23  ;;  %v817_v33 = vmax.f32 %v743_v26, 0.0  ;;  %v3054_v23 = vld [vmem:[#allocation10 + $0x18] sm:$0xff]   ;;  %v3055_v26 = vld [vmem:[#allocation10 + $0x60] sm:$0xff]  }
 0x205   : > { %v749_v32 = vadd.f32 %v748_v31, %v3774_v45  ;;  %v818_v35 = vmax.f32 %v745_v28, 0.0  ;;  %2828 = vmatpush3.bf16.msra.mxu1 %v3054_v23 }
 0x206   : > { %v819_v34 = vmax.f32 %v747_v30, 0.0  ;;  %2821 = vmatprep.subr.bf16.mxu1 %v3055_v26 }
 0x207   : > { %v820_v36 = vmax.f32 %v749_v32, 0.0  ;;  %v3056_v32 = vld [vmem:[#allocation10 + $0x20] sm:$0xff]  }
 0x208   : > { %v853_v37 = vpack.c.bf16 %v819_v34, %v817_v33 }
 0x209   : > { %v854_v38 = vpack.c.bf16 %v820_v36, %v818_v35  ;;  %v752_v39 = vpop.f32.mrb[60].mxu0  ;;  %v3057_v35 = vld [vmem:[#allocation10 + $0x68] sm:$0xff]   ;;  %2829 = vmatpush3.bf16.msra.mxu1 %v3056_v32 }
 0x20a   : > { %v753_v0 = vadd.f32 %v752_v39, %v3771_v44  ;;  %v754_v42 = vpop.f32.mrb[61].mxu0  ;;  %2822 = vmatprep.subr.bf16.mxu1 %v3057_v35 }
 0x20b   : > { %v755_v43 = vadd.f32 %v754_v42, %v3774_v45  ;;  %v756_v46 = vpop.f32.mrb[62].mxu0  ;;  %1233 = vmatprep.mubr.bf16.mxu1 %v854_v38  ;;  %v3058_v42 = vld [vmem:[#allocation10 + $0x28] sm:$0xff]  }
 0x20c   : > { %v757_v47 = vadd.f32 %v756_v46, %v3771_v44  ;;  %v758_v48 = vpop.f32.mrb[63].mxu0  ;;  %1234 = vmatmul.mubr.bf16.gmra.mrb[56].mxu1 %v853_v37  ;;  %v821_v50 = vmax.f32 %v753_v0, 0.0  ;;  %v3844_v44 = vrot.slane %v889_v56, %v3763_v40 }
 0x20d   : > { %v759_v49 = vadd.f32 %v758_v48, %v3774_v45  ;;  %v822_v52 = vmax.f32 %v755_v43, 0.0  ;;  %v3847_v45 = vrot.slane %v889_v56, %v3768_v41  ;;  %2830 = vmatpush3.bf16.msra.mxu1 %v3058_v42 }
 0x20e   : > { %v823_v51 = vmax.f32 %v757_v47, 0.0  ;;  %v3059_v47 = vld [vmem:[#allocation10 + $0x70] sm:$0xff]  }
 0x20f   : > { %v824_v53 = vmax.f32 %v759_v49, 0.0  ;;  %2823 = vmatprep.subr.bf16.mxu1 %v3059_v47 }
 0x210   : > { %v855_v54 = vpack.c.bf16 %v823_v51, %v821_v50 }
 0x211   : > { %v856_v55 = vpack.c.bf16 %v824_v53, %v822_v52  ;;  %v3060_v53 = vld [vmem:[#allocation10 + $0x30] sm:$0xff]  }
 0x212   : > { %2831 = vmatpush3.bf16.msra.mxu1 %v3060_v53 }
 0x213   : > { %1243 = vmatprep.mubr.bf16.mxu1 %v856_v55 }
 0x214   : > { %1244 = vmatmul.mubr.bf16.gmra.mrb[60].mxu1 %v855_v54 }
 0x26f   : > { %v1095_v59 = vpop.f32.mrb[0].mxu1 }
 0x270   : > { %v1096_v60 = vadd.f32 %v1095_v59, %v3844_v44  ;;  %v1097_v61 = vpop.f32.mrb[1].mxu1 }
 0x271   : > { %v1098_v62 = vadd.f32 %v1097_v61, %v3847_v45  ;;  %v1099_v63 = vpop.f32.mrb[2].mxu1 }
 0x272   : > { %v1100_v1 = vadd.f32 %v1099_v63, %v3844_v44  ;;  %v1101_v2 = vpop.f32.mrb[3].mxu1  ;;  %v1254_v6 = vmax.f32 %v1096_v60, 0.0 }
 0x273   : > { %v1102_v4 = vadd.f32 %v1101_v2, %v3847_v45  ;;  %v1255_v9 = vmax.f32 %v1098_v62, 0.0 }
 0x274   : > { %v1256_v7 = vmax.f32 %v1100_v1, 0.0 }
 0x275   : > { %v1257_v10 = vmax.f32 %v1102_v4, 0.0 }
 0x276   : > { %v1318_v11 = vpack.c.bf16 %v1256_v7, %v1254_v6 }
 0x277   : > { %v1319_v12 = vpack.c.bf16 %v1257_v10, %v1255_v9  ;;  %v1105_v13 = vpop.f32.mrb[4].mxu1 }
 0x278   : > { %v1106_v15 = vadd.f32 %v1105_v13, %v3844_v44  ;;  %v1107_v16 = vpop.f32.mrb[5].mxu1 }
 0x279   : > { %v1108_v18 = vadd.f32 %v1107_v16, %v3847_v45  ;;  %v1109_v19 = vpop.f32.mrb[6].mxu1  ;;  %1586 = vmatprep.mubr.bf16.mxu0 %v1319_v12 }
 0x27a   : > { %v1110_v20 = vadd.f32 %v1109_v19, %v3844_v44  ;;  %v1111_v21 = vpop.f32.mrb[7].mxu1  ;;  %1587 = vmatmul.mubr.bf16.vlgmr.msra.gmra.mrb[64].mxu0 %v1318_v11  ;;  %v1258_v24 = vmax.f32 %v1106_v15, 0.0 }
 0x27b   : > { %v1112_v22 = vadd.f32 %v1111_v21, %v3847_v45  ;;  %2706 = vmatpush3.bf16.msra.mxu0 %v3048_v58  ;;  %v1259_v27 = vmax.f32 %v1108_v18, 0.0 }
 0x27c   : > { %v1260_v25 = vmax.f32 %v1110_v20, 0.0  ;;  %2707 = vmatprep.subr.bf16.mxu0 %v3049_v3 }
 0x27d   : > { %v1261_v28 = vmax.f32 %v1112_v22, 0.0 }
 0x27e   : > { %v1320_v29 = vpack.c.bf16 %v1260_v25, %v1258_v24 }
 0x27f   : > { %v1321_v30 = vpack.c.bf16 %v1261_v28, %v1259_v27  ;;  %v1115_v31 = vpop.f32.mrb[8].mxu1  ;;  %2708 = vmatpush3.bf16.msra.mxu0 %v3050_v5 }
 0x280   : > { %v1116_v33 = vadd.f32 %v1115_v31, %v3844_v44  ;;  %v1117_v34 = vpop.f32.mrb[9].mxu1  ;;  %2709 = vmatprep.subr.bf16.mxu0 %v3051_v8 }
 0x281   : > { %v1118_v36 = vadd.f32 %v1117_v34, %v3847_v45  ;;  %v1119_v37 = vpop.f32.mrb[10].mxu1  ;;  %1596 = vmatprep.mubr.bf16.mxu0 %v1321_v30 }
 0x282   : > { %v1120_v38 = vadd.f32 %v1119_v37, %v3844_v44  ;;  %v1121_v39 = vpop.f32.mrb[11].mxu1  ;;  %1597 = vmatmul.mubr.bf16.gmra.mrb[68].mxu0 %v1320_v29  ;;  %v1262_v43 = vmax.f32 %v1116_v33, 0.0 }
 0x283   : > { %v1122_v0 = vadd.f32 %v1121_v39, %v3847_v45  ;;  %2710 = vmatpush3.bf16.msra.mxu0 %v3052_v14  ;;  %v1263_v48 = vmax.f32 %v1118_v36, 0.0 }
 0x284   : > { %v1264_v46 = vmax.f32 %v1120_v38, 0.0  ;;  %2711 = vmatprep.subr.bf16.mxu0 %v3053_v17 }
 0x285   : > { %v1265_v49 = vmax.f32 %v1122_v0, 0.0 }
 0x286   : > { %v1322_v50 = vpack.c.bf16 %v1264_v46, %v1262_v43 }
 0x287   : > { %v1323_v51 = vpack.c.bf16 %v1265_v49, %v1263_v48  ;;  %v1125_v52 = vpop.f32.mrb[12].mxu1  ;;  %2712 = vmatpush3.bf16.msra.mxu0 %v3054_v23 }
 0x288   : > { %v1126_v54 = vadd.f32 %v1125_v52, %v3844_v44  ;;  %v1127_v55 = vpop.f32.mrb[13].mxu1  ;;  %2713 = vmatprep.subr.bf16.mxu0 %v3055_v26 }
 0x289   : > { %v1128_v56 = vadd.f32 %v1127_v55, %v3847_v45  ;;  %v1129_v57 = vpop.f32.mrb[14].mxu1  ;;  %1606 = vmatprep.mubr.bf16.mxu0 %v1323_v51 }
 0x28a   : > { %v1130_v58 = vadd.f32 %v1129_v57, %v3844_v44  ;;  %v1131_v59 = vpop.f32.mrb[15].mxu1  ;;  %1607 = vmatmul.mubr.bf16.gmra.mrb[72].mxu0 %v1322_v50  ;;  %v1266_v61 = vmax.f32 %v1126_v54, 0.0 }
 0x28b   : > { %v1132_v60 = vadd.f32 %v1131_v59, %v3847_v45  ;;  %2714 = vmatpush3.bf16.msra.mxu0 %v3056_v32  ;;  %v1267_v63 = vmax.f32 %v1128_v56, 0.0 }
 0x28c   : > { %v1268_v62 = vmax.f32 %v1130_v58, 0.0  ;;  %2715 = vmatprep.subr.bf16.mxu0 %v3057_v35 }
 0x28d   : > { %v1269_v1 = vmax.f32 %v1132_v60, 0.0 }
 0x28e   : > { %v1324_v2 = vpack.c.bf16 %v1268_v62, %v1266_v61 }
 0x28f   : > { %v1325_v3 = vpack.c.bf16 %v1269_v1, %v1267_v63  ;;  %v1135_v4 = vpop.f32.mrb[16].mxu1  ;;  %2716 = vmatpush3.bf16.msra.mxu0 %v3058_v42 }
 0x290   : > { %v1136_v5 = vadd.f32 %v1135_v4, %v3844_v44  ;;  %v1137_v6 = vpop.f32.mrb[17].mxu1  ;;  %2717 = vmatprep.subr.bf16.mxu0 %v3059_v47 }
 0x291   : > { %v1138_v7 = vadd.f32 %v1137_v6, %v3847_v45  ;;  %v1139_v8 = vpop.f32.mrb[18].mxu1  ;;  %1616 = vmatprep.mubr.bf16.mxu0 %v1325_v3 }
 0x292   : > { %v1140_v9 = vadd.f32 %v1139_v8, %v3844_v44  ;;  %v1141_v10 = vpop.f32.mrb[19].mxu1  ;;  %1617 = vmatmul.mubr.bf16.gmra.mrb[76].mxu0 %v1324_v2  ;;  %v1270_v12 = vmax.f32 %v1136_v5, 0.0 }
 0x293   : > { %v1142_v11 = vadd.f32 %v1141_v10, %v3847_v45  ;;  %2718 = vmatpush3.bf16.msra.mxu0 %v3060_v53  ;;  %v1271_v14 = vmax.f32 %v1138_v7, 0.0 }
 0x294   : > { %v1272_v13 = vmax.f32 %v1140_v9, 0.0 }
 0x295   : > { %v1273_v15 = vmax.f32 %v1142_v11, 0.0 }
 0x296   : > { %v1326_v16 = vpack.c.bf16 %v1272_v13, %v1270_v12 }
 0x297   : > { %v1327_v17 = vpack.c.bf16 %v1273_v15, %v1271_v14  ;;  %v1145_v18 = vpop.f32.mrb[20].mxu1 }
 0x298   : > { %v1146_v19 = vadd.f32 %v1145_v18, %v3844_v44  ;;  %v1147_v20 = vpop.f32.mrb[21].mxu1 }
 0x299   : > { %v1148_v21 = vadd.f32 %v1147_v20, %v3847_v45  ;;  %v1149_v22 = vpop.f32.mrb[22].mxu1  ;;  %1626 = vmatprep.mubr.bf16.mxu0 %v1327_v17 }
 0x29a   : > { %v1150_v23 = vadd.f32 %v1149_v22, %v3844_v44  ;;  %v1151_v24 = vpop.f32.mrb[23].mxu1  ;;  %1627 = vmatmul.mubr.bf16.gmra.mrb[80].mxu0 %v1326_v16  ;;  %v1274_v26 = vmax.f32 %v1146_v19, 0.0 }
 0x29b   : > { %v1152_v25 = vadd.f32 %v1151_v24, %v3847_v45  ;;  %v1275_v28 = vmax.f32 %v1148_v21, 0.0 }
 0x29c   : > { %v1276_v27 = vmax.f32 %v1150_v23, 0.0 }
 0x29d   : > { %v1277_v29 = vmax.f32 %v1152_v25, 0.0 }
 0x29e   : > { %v1328_v30 = vpack.c.bf16 %v1276_v27, %v1274_v26 }
 0x29f   : > { %v1329_v31 = vpack.c.bf16 %v1277_v29, %v1275_v28  ;;  %v1155_v32 = vpop.f32.mrb[24].mxu1 }
 0x2a0   : > { %v1156_v33 = vadd.f32 %v1155_v32, %v3844_v44  ;;  %v1157_v34 = vpop.f32.mrb[25].mxu1 }
 0x2a1   : > { %v1158_v35 = vadd.f32 %v1157_v34, %v3847_v45  ;;  %v1159_v36 = vpop.f32.mrb[26].mxu1  ;;  %1636 = vmatprep.mubr.bf16.mxu0 %v1329_v31 }
 0x2a2   : > { %v1160_v37 = vadd.f32 %v1159_v36, %v3844_v44  ;;  %v1161_v38 = vpop.f32.mrb[27].mxu1  ;;  %1637 = vmatmul.mubr.bf16.gmra.mrb[84].mxu0 %v1328_v30  ;;  %v1278_v0 = vmax.f32 %v1156_v33, 0.0 }
 0x2a3   : > { %v1162_v39 = vadd.f32 %v1161_v38, %v3847_v45  ;;  %v1279_v43 = vmax.f32 %v1158_v35, 0.0 }
 0x2a4   : > { %v1280_v42 = vmax.f32 %v1160_v37, 0.0 }
 0x2a5   : > { %v1281_v46 = vmax.f32 %v1162_v39, 0.0 }
 0x2a6   : > { %v1330_v47 = vpack.c.bf16 %v1280_v42, %v1278_v0 }
 0x2a7   : > { %v1331_v48 = vpack.c.bf16 %v1281_v46, %v1279_v43  ;;  %v1165_v49 = vpop.f32.mrb[28].mxu1 }
 0x2a8   : > { %v1166_v50 = vadd.f32 %v1165_v49, %v3844_v44  ;;  %v1167_v51 = vpop.f32.mrb[29].mxu1 }
 0x2a9   : > { %v1168_v52 = vadd.f32 %v1167_v51, %v3847_v45  ;;  %v1169_v53 = vpop.f32.mrb[30].mxu1  ;;  %1646 = vmatprep.mubr.bf16.mxu0 %v1331_v48 }
 0x2aa   : > { %v1170_v54 = vadd.f32 %v1169_v53, %v3844_v44  ;;  %v1171_v55 = vpop.f32.mrb[31].mxu1  ;;  %1647 = vmatmul.mubr.bf16.gmra.mrb[88].mxu0 %v1330_v47  ;;  %v1282_v57 = vmax.f32 %v1166_v50, 0.0 }
 0x2ab   : > { %v1172_v56 = vadd.f32 %v1171_v55, %v3847_v45  ;;  %v1283_v59 = vmax.f32 %v1168_v52, 0.0 }
 0x2ac   : > { %v1284_v58 = vmax.f32 %v1170_v54, 0.0 }
 0x2ad   : > { %v1285_v60 = vmax.f32 %v1172_v56, 0.0 }
 0x2ae   : > { %v1332_v61 = vpack.c.bf16 %v1284_v58, %v1282_v57 }
 0x2af   : > { %v1333_v62 = vpack.c.bf16 %v1285_v60, %v1283_v59  ;;  %v1175_v63 = vpop.f32.mrb[32].mxu1 }
 0x2b0   : > { %v1176_v1 = vadd.f32 %v1175_v63, %v3844_v44  ;;  %v1177_v2 = vpop.f32.mrb[33].mxu1 }
 0x2b1   : > { %v1178_v3 = vadd.f32 %v1177_v2, %v3847_v45  ;;  %v1179_v4 = vpop.f32.mrb[34].mxu1  ;;  %1656 = vmatprep.mubr.bf16.mxu0 %v1333_v62 }
 0x2b2   : > { %v1180_v5 = vadd.f32 %v1179_v4, %v3844_v44  ;;  %v1181_v6 = vpop.f32.mrb[35].mxu1  ;;  %1657 = vmatmul.mubr.bf16.gmra.mrb[92].mxu0 %v1332_v61  ;;  %v1286_v8 = vmax.f32 %v1176_v1, 0.0 }
 0x2b3   : > { %v1182_v7 = vadd.f32 %v1181_v6, %v3847_v45  ;;  %v1287_v10 = vmax.f32 %v1178_v3, 0.0  ;;  %v3061_v3 = vld [vmem:[#allocation10 + $0x78] sm:$0xff]  }
 0x2b4   : > { %v1288_v9 = vmax.f32 %v1180_v5, 0.0  ;;  %v3062_v5 = vld [vmem:[#allocation10 + $0x38] sm:$0xff]   ;;  %2719 = vmatprep.subr.bf16.mxu0 %v3061_v3  ;;  %2824 = vmatprep.subr.bf16.mxu1 %v3061_v3 }
 0x2b5   : > { %v1289_v11 = vmax.f32 %v1182_v7, 0.0  ;;  %2720 = vmatpush3.bf16.msra.mxu0 %v3062_v5  ;;  %2832 = vmatpush3.bf16.msra.mxu1 %v3062_v5 }
 0x2b6   : > { %v1334_v12 = vpack.c.bf16 %v1288_v9, %v1286_v8 }
 0x2b7   : > { %v1335_v13 = vpack.c.bf16 %v1289_v11, %v1287_v10  ;;  %v1185_v14 = vpop.f32.mrb[36].mxu1 }
 0x2b8   : > { %v1186_v15 = vadd.f32 %v1185_v14, %v3844_v44  ;;  %v1187_v16 = vpop.f32.mrb[37].mxu1 }
 0x2b9   : > { %v1188_v17 = vadd.f32 %v1187_v16, %v3847_v45  ;;  %v1189_v18 = vpop.f32.mrb[38].mxu1  ;;  %1666 = vmatprep.mubr.bf16.mxu0 %v1335_v13 }
 0x2ba   : > { %v1190_v19 = vadd.f32 %v1189_v18, %v3844_v44  ;;  %v1191_v20 = vpop.f32.mrb[39].mxu1  ;;  %1667 = vmatmul.mubr.bf16.gmra.mrb[96].mxu0 %v1334_v12  ;;  %v1290_v22 = vmax.f32 %v1186_v15, 0.0 }
 0x2bb   : > { %v1192_v21 = vadd.f32 %v1191_v20, %v3847_v45  ;;  %v1291_v24 = vmax.f32 %v1188_v17, 0.0 }
 0x2bc   : > { %v1292_v23 = vmax.f32 %v1190_v19, 0.0 }
 0x2bd   : > { %v1293_v25 = vmax.f32 %v1192_v21, 0.0 }
 0x2be   : > { %v1336_v26 = vpack.c.bf16 %v1292_v23, %v1290_v22 }
 0x2bf   : > { %v1337_v27 = vpack.c.bf16 %v1293_v25, %v1291_v24  ;;  %v1195_v28 = vpop.f32.mrb[40].mxu1 }
 0x2c0   : > { %v1196_v29 = vadd.f32 %v1195_v28, %v3844_v44  ;;  %v1197_v30 = vpop.f32.mrb[41].mxu1 }
 0x2c1   : > { %v1198_v31 = vadd.f32 %v1197_v30, %v3847_v45  ;;  %v1199_v32 = vpop.f32.mrb[42].mxu1  ;;  %1676 = vmatprep.mubr.bf16.mxu0 %v1337_v27 }
 0x2c2   : > { %v1200_v33 = vadd.f32 %v1199_v32, %v3844_v44  ;;  %v1201_v34 = vpop.f32.mrb[43].mxu1  ;;  %1677 = vmatmul.mubr.bf16.gmra.mrb[100].mxu0 %v1336_v26  ;;  %v1294_v36 = vmax.f32 %v1196_v29, 0.0 }
 0x2c3   : > { %v1202_v35 = vadd.f32 %v1201_v34, %v3847_v45  ;;  %v1295_v38 = vmax.f32 %v1198_v31, 0.0 }
 0x2c4   : > { %v1296_v37 = vmax.f32 %v1200_v33, 0.0 }
 0x2c5   : > { %v1297_v39 = vmax.f32 %v1202_v35, 0.0 }
 0x2c6   : > { %v1338_v0 = vpack.c.bf16 %v1296_v37, %v1294_v36 }
 0x2c7   : > { %v1339_v42 = vpack.c.bf16 %v1297_v39, %v1295_v38  ;;  %v1205_v43 = vpop.f32.mrb[44].mxu1 }
 0x2c8   : > { %v1206_v46 = vadd.f32 %v1205_v43, %v3844_v44  ;;  %v1207_v47 = vpop.f32.mrb[45].mxu1 }
 0x2c9   : > { %v1208_v48 = vadd.f32 %v1207_v47, %v3847_v45  ;;  %v1209_v49 = vpop.f32.mrb[46].mxu1  ;;  %1686 = vmatprep.mubr.bf16.mxu0 %v1339_v42 }
 0x2ca   : > { %v1210_v50 = vadd.f32 %v1209_v49, %v3844_v44  ;;  %v1211_v51 = vpop.f32.mrb[47].mxu1  ;;  %1687 = vmatmul.mubr.bf16.gmra.mrb[104].mxu0 %v1338_v0  ;;  %v1298_v53 = vmax.f32 %v1206_v46, 0.0 }
 0x2cb   : > { %v1212_v52 = vadd.f32 %v1211_v51, %v3847_v45  ;;  %v1299_v55 = vmax.f32 %v1208_v48, 0.0 }
 0x2cc   : > { %v1300_v54 = vmax.f32 %v1210_v50, 0.0 }
 0x2cd   : > { %v1301_v56 = vmax.f32 %v1212_v52, 0.0 }
 0x2ce   : > { %v1340_v57 = vpack.c.bf16 %v1300_v54, %v1298_v53 }
 0x2cf   : > { %v1341_v58 = vpack.c.bf16 %v1301_v56, %v1299_v55  ;;  %v1215_v59 = vpop.f32.mrb[48].mxu1 }
 0x2d0   : > { %v1216_v60 = vadd.f32 %v1215_v59, %v3844_v44  ;;  %v1217_v61 = vpop.f32.mrb[49].mxu1 }
 0x2d1   : > { %v1218_v62 = vadd.f32 %v1217_v61, %v3847_v45  ;;  %v1219_v63 = vpop.f32.mrb[50].mxu1  ;;  %1696 = vmatprep.mubr.bf16.mxu0 %v1341_v58 }
 0x2d2   : > { %v1220_v1 = vadd.f32 %v1219_v63, %v3844_v44  ;;  %v1221_v2 = vpop.f32.mrb[51].mxu1  ;;  %1697 = vmatmul.mubr.bf16.gmra.mrb[108].mxu0 %v1340_v57  ;;  %v1302_v6 = vmax.f32 %v1216_v60, 0.0  ;;  %v1382_v57 = vld [vmem:[%s4372_s6] sm:$0x3] }
 0x2d3   : > { %v1222_v4 = vadd.f32 %v1221_v2, %v3847_v45  ;;  %v1303_v8 = vmax.f32 %v1218_v62, 0.0  ;;  %v3917_v58 = vrot.slane %v1382_v57, %v3763_v40 }
 0x2d4   : > { %v1304_v7 = vmax.f32 %v1220_v1, 0.0 }
 0x2d5   : > { %v1305_v9 = vmax.f32 %v1222_v4, 0.0 }
 0x2d6   : > { %v1342_v10 = vpack.c.bf16 %v1304_v7, %v1302_v6 }
 0x2d7   : > { %v1343_v11 = vpack.c.bf16 %v1305_v9, %v1303_v8  ;;  %v1225_v12 = vpop.f32.mrb[52].mxu1 }
 0x2d8   : > { %v1226_v13 = vadd.f32 %v1225_v12, %v3844_v44  ;;  %v1227_v14 = vpop.f32.mrb[53].mxu1 }
 0x2d9   : > { %v1228_v15 = vadd.f32 %v1227_v14, %v3847_v45  ;;  %v1229_v16 = vpop.f32.mrb[54].mxu1  ;;  %1706 = vmatprep.mubr.bf16.mxu0 %v1343_v11 }
 0x2da   : > { %v1230_v17 = vadd.f32 %v1229_v16, %v3844_v44  ;;  %v1231_v18 = vpop.f32.mrb[55].mxu1  ;;  %1707 = vmatmul.mubr.bf16.gmra.mrb[112].mxu0 %v1342_v10  ;;  %v1306_v20 = vmax.f32 %v1226_v13, 0.0 }
 0x2db   : > { %v1232_v19 = vadd.f32 %v1231_v18, %v3847_v45  ;;  %v1307_v22 = vmax.f32 %v1228_v15, 0.0 }
 0x2dc   : > { %v1308_v21 = vmax.f32 %v1230_v17, 0.0 }
 0x2dd   : > { %v1309_v23 = vmax.f32 %v1232_v19, 0.0 }
 0x2de   : > { %v1344_v24 = vpack.c.bf16 %v1308_v21, %v1306_v20 }
 0x2df   : > { %v1345_v25 = vpack.c.bf16 %v1309_v23, %v1307_v22  ;;  %v1235_v26 = vpop.f32.mrb[56].mxu1 }
 0x2e0   : > { %v1236_v27 = vadd.f32 %v1235_v26, %v3844_v44  ;;  %v1237_v28 = vpop.f32.mrb[57].mxu1 }
 0x2e1   : > { %v1238_v29 = vadd.f32 %v1237_v28, %v3847_v45  ;;  %v1239_v30 = vpop.f32.mrb[58].mxu1  ;;  %1716 = vmatprep.mubr.bf16.mxu0 %v1345_v25 }
 0x2e2   : > { %v1240_v31 = vadd.f32 %v1239_v30, %v3844_v44  ;;  %v1241_v32 = vpop.f32.mrb[59].mxu1  ;;  %1717 = vmatmul.mubr.bf16.gmra.mrb[116].mxu0 %v1344_v24  ;;  %v1310_v34 = vmax.f32 %v1236_v27, 0.0 }
 0x2e3   : > { %v1242_v33 = vadd.f32 %v1241_v32, %v3847_v45  ;;  %v1311_v36 = vmax.f32 %v1238_v29, 0.0 }
 0x2e4   : > { %v1312_v35 = vmax.f32 %v1240_v31, 0.0 }
 0x2e5   : > { %v1313_v37 = vmax.f32 %v1242_v33, 0.0 }
 0x2e6   : > { %v1346_v38 = vpack.c.bf16 %v1312_v35, %v1310_v34 }
 0x2e7   : > { %v1347_v39 = vpack.c.bf16 %v1313_v37, %v1311_v36  ;;  %v1245_v0 = vpop.f32.mrb[60].mxu1 }
 0x2e8   : > { %v1246_v42 = vadd.f32 %v1245_v0, %v3844_v44  ;;  %v1247_v43 = vpop.f32.mrb[61].mxu1 }
 0x2e9   : > { %v1248_v46 = vadd.f32 %v1247_v43, %v3847_v45  ;;  %v1249_v47 = vpop.f32.mrb[62].mxu1  ;;  %1726 = vmatprep.mubr.bf16.mxu0 %v1347_v39 }
 0x2ea   : > { %v1250_v48 = vadd.f32 %v1249_v47, %v3844_v44  ;;  %v1251_v49 = vpop.f32.mrb[63].mxu1  ;;  %1727 = vmatmul.mubr.bf16.gmra.mrb[120].mxu0 %v1346_v38  ;;  %v1314_v51 = vmax.f32 %v1246_v42, 0.0  ;;  %v3920_v44 = vrot.slane %v1382_v57, %v3768_v41 }
 0x2eb   : > { %v1252_v50 = vadd.f32 %v1251_v49, %v3847_v45  ;;  %v1315_v53 = vmax.f32 %v1248_v46, 0.0 }
 0x2ec   : > { %v1316_v52 = vmax.f32 %v1250_v48, 0.0 }
 0x2ed   : > { %v1317_v54 = vmax.f32 %v1252_v50, 0.0 }
 0x2ee   : > { %v1348_v55 = vpack.c.bf16 %v1316_v52, %v1314_v51 }
 0x2ef   : > { %v1349_v56 = vpack.c.bf16 %v1317_v54, %v1315_v53 }
 0x2f1   : > { %1736 = vmatprep.mubr.bf16.mxu0 %v1349_v56 }
 0x2f2   : > { %1737 = vmatmul.mubr.bf16.gmra.mrb[124].mxu0 %v1348_v55 }
 0x34d   : > { %v1588_v59 = vpop.f32.mrb[64].mxu0 }
 0x34e   : > { %v1589_v45 = vadd.f32 %v1588_v59, %v3917_v58  ;;  %v1590_v60 = vpop.f32.mrb[65].mxu0 }
 0x34f   : > { %v1591_v61 = vadd.f32 %v1590_v60, %v3920_v44  ;;  %v1592_v62 = vpop.f32.mrb[66].mxu0 }
 0x350   : > { %v1593_v63 = vadd.f32 %v1592_v62, %v3917_v58  ;;  %v1594_v1 = vpop.f32.mrb[67].mxu0  ;;  %v1747_v3 = vmax.f32 %v1589_v45, 0.0 }
 0x351   : > { %v1595_v2 = vadd.f32 %v1594_v1, %v3920_v44  ;;  %v1748_v5 = vmax.f32 %v1591_v61, 0.0 }
 0x352   : > { %v1749_v4 = vmax.f32 %v1593_v63, 0.0 }
 0x353   : > { %v1750_v40 = vmax.f32 %v1595_v2, 0.0 }
 0x354   : > { %v1811_v6 = vpack.c.bf16 %v1749_v4, %v1747_v3 }
 0x355   : > { %v1812_v7 = vpack.c.bf16 %v1750_v40, %v1748_v5  ;;  %v1598_v41 = vpop.f32.mrb[68].mxu0 }
 0x356   : > { %v1599_v8 = vadd.f32 %v1598_v41, %v3917_v58  ;;  %v1600_v9 = vpop.f32.mrb[69].mxu0 }
 0x357   : > { %v1601_v10 = vadd.f32 %v1600_v9, %v3920_v44  ;;  %v1602_v11 = vpop.f32.mrb[70].mxu0  ;;  %2010 = vmatprep.mubr.bf16.mxu0 %v1812_v7 }
 0x358   : > { %v1603_v12 = vadd.f32 %v1602_v11, %v3917_v58  ;;  %v1604_v13 = vpop.f32.mrb[71].mxu0  ;;  %2011 = vmatmul.mubr.bf16.vlgmr.msra.gmra.mrb[128].mxu0 %v1811_v6  ;;  %v1751_v15 = vmax.f32 %v1599_v8, 0.0 }
 0x359   : > { %v1605_v14 = vadd.f32 %v1604_v13, %v3920_v44  ;;  %v1752_v17 = vmax.f32 %v1601_v10, 0.0 }
 0x35a   : > { %v1753_v16 = vmax.f32 %v1603_v12, 0.0 }
 0x35b   : > { %v1754_v18 = vmax.f32 %v1605_v14, 0.0 }
 0x35c   : > { %v1813_v19 = vpack.c.bf16 %v1753_v16, %v1751_v15 }
 0x35d   : > { %v1814_v20 = vpack.c.bf16 %v1754_v18, %v1752_v17  ;;  %v1608_v21 = vpop.f32.mrb[72].mxu0 }
 0x35e   : > { %v1609_v22 = vadd.f32 %v1608_v21, %v3917_v58  ;;  %v1610_v23 = vpop.f32.mrb[73].mxu0 }
 0x35f   : > { %v1611_v24 = vadd.f32 %v1610_v23, %v3920_v44  ;;  %v1612_v25 = vpop.f32.mrb[74].mxu0  ;;  %2018 = vmatprep.mubr.bf16.mxu0 %v1814_v20 }
 0x360   : > { %v1613_v26 = vadd.f32 %v1612_v25, %v3917_v58  ;;  %v1614_v27 = vpop.f32.mrb[75].mxu0  ;;  %2019 = vmatmul.mubr.bf16.gmra.mrb[132].mxu0 %v1813_v19  ;;  %v1755_v29 = vmax.f32 %v1609_v22, 0.0 }
 0x361   : > { %v1615_v28 = vadd.f32 %v1614_v27, %v3920_v44  ;;  %v1756_v31 = vmax.f32 %v1611_v24, 0.0 }
 0x362   : > { %v1757_v30 = vmax.f32 %v1613_v26, 0.0 }
 0x363   : > { %v1758_v32 = vmax.f32 %v1615_v28, 0.0 }
 0x364   : > { %v1815_v33 = vpack.c.bf16 %v1757_v30, %v1755_v29 }
 0x365   : > { %v1816_v34 = vpack.c.bf16 %v1758_v32, %v1756_v31  ;;  %v1618_v35 = vpop.f32.mrb[76].mxu0 }
 0x366   : > { %v1619_v36 = vadd.f32 %v1618_v35, %v3917_v58  ;;  %v1620_v37 = vpop.f32.mrb[77].mxu0 }
 0x367   : > { %v1621_v38 = vadd.f32 %v1620_v37, %v3920_v44  ;;  %v1622_v39 = vpop.f32.mrb[78].mxu0  ;;  %2026 = vmatprep.mubr.bf16.mxu1 %v1816_v34 }
 0x368   : > { %v1623_v0 = vadd.f32 %v1622_v39, %v3917_v58  ;;  %v1624_v42 = vpop.f32.mrb[79].mxu0  ;;  %2027 = vmatmul.mubr.bf16.vlgmr.msra.gmra.mrb[64].mxu1 %v1815_v33  ;;  %v1759_v46 = vmax.f32 %v1619_v36, 0.0 }
 0x369   : > { %v1625_v43 = vadd.f32 %v1624_v42, %v3920_v44  ;;  %v1760_v48 = vmax.f32 %v1621_v38, 0.0 }
 0x36a   : > { %v1761_v47 = vmax.f32 %v1623_v0, 0.0 }
 0x36b   : > { %v1762_v49 = vmax.f32 %v1625_v43, 0.0 }
 0x36c   : > { %v1817_v50 = vpack.c.bf16 %v1761_v47, %v1759_v46 }
 0x36d   : > { %v1818_v51 = vpack.c.bf16 %v1762_v49, %v1760_v48  ;;  %v1628_v52 = vpop.f32.mrb[80].mxu0 }
 0x36e   : > { %v1629_v53 = vadd.f32 %v1628_v52, %v3917_v58  ;;  %v1630_v54 = vpop.f32.mrb[81].mxu0 }
 0x36f   : > { %v1631_v55 = vadd.f32 %v1630_v54, %v3920_v44  ;;  %v1632_v56 = vpop.f32.mrb[82].mxu0  ;;  %2034 = vmatprep.mubr.bf16.mxu1 %v1818_v51 }
 0x370   : > { %v1633_v57 = vadd.f32 %v1632_v56, %v3917_v58  ;;  %v1634_v59 = vpop.f32.mrb[83].mxu0  ;;  %2035 = vmatmul.mubr.bf16.gmra.mrb[68].mxu1 %v1817_v50  ;;  %v1763_v60 = vmax.f32 %v1629_v53, 0.0 }
 0x371   : > { %v1635_v45 = vadd.f32 %v1634_v59, %v3920_v44  ;;  %v1764_v62 = vmax.f32 %v1631_v55, 0.0 }
 0x372   : > { %v1765_v61 = vmax.f32 %v1633_v57, 0.0 }
 0x373   : > { %v1766_v63 = vmax.f32 %v1635_v45, 0.0 }
 0x374   : > { %v1819_v1 = vpack.c.bf16 %v1765_v61, %v1763_v60 }
 0x375   : > { %v1820_v2 = vpack.c.bf16 %v1766_v63, %v1764_v62  ;;  %v1638_v3 = vpop.f32.mrb[84].mxu0 }
 0x376   : > { %v1639_v4 = vadd.f32 %v1638_v3, %v3917_v58  ;;  %v1640_v5 = vpop.f32.mrb[85].mxu0 }
 0x377   : > { %v1641_v40 = vadd.f32 %v1640_v5, %v3920_v44  ;;  %v1642_v6 = vpop.f32.mrb[86].mxu0  ;;  %2042 = vmatprep.mubr.bf16.mxu1 %v1820_v2 }
 0x378   : > { %v1643_v7 = vadd.f32 %v1642_v6, %v3917_v58  ;;  %v1644_v41 = vpop.f32.mrb[87].mxu0  ;;  %2043 = vmatmul.mubr.bf16.gmra.mrb[72].mxu1 %v1819_v1  ;;  %v1767_v9 = vmax.f32 %v1639_v4, 0.0 }
 0x379   : > { %v1645_v8 = vadd.f32 %v1644_v41, %v3920_v44  ;;  %v1768_v11 = vmax.f32 %v1641_v40, 0.0 }
 0x37a   : > { %v1769_v10 = vmax.f32 %v1643_v7, 0.0 }
 0x37b   : > { %v1770_v12 = vmax.f32 %v1645_v8, 0.0 }
 0x37c   : > { %v1821_v13 = vpack.c.bf16 %v1769_v10, %v1767_v9 }
 0x37d   : > { %v1822_v14 = vpack.c.bf16 %v1770_v12, %v1768_v11  ;;  %v1648_v15 = vpop.f32.mrb[88].mxu0 }
 0x37e   : > { %v1649_v16 = vadd.f32 %v1648_v15, %v3917_v58  ;;  %v1650_v17 = vpop.f32.mrb[89].mxu0 }
 0x37f   : > { %v1651_v18 = vadd.f32 %v1650_v17, %v3920_v44  ;;  %v1652_v19 = vpop.f32.mrb[90].mxu0  ;;  %2050 = vmatprep.mubr.bf16.mxu1 %v1822_v14 }
 0x380   : > { %v1653_v20 = vadd.f32 %v1652_v19, %v3917_v58  ;;  %v1654_v21 = vpop.f32.mrb[91].mxu0  ;;  %2051 = vmatmul.mubr.bf16.gmra.mrb[76].mxu1 %v1821_v13  ;;  %v1771_v23 = vmax.f32 %v1649_v16, 0.0 }
 0x381   : > { %v1655_v22 = vadd.f32 %v1654_v21, %v3920_v44  ;;  %v1772_v25 = vmax.f32 %v1651_v18, 0.0 }
 0x382   : > { %v1773_v24 = vmax.f32 %v1653_v20, 0.0 }
 0x383   : > { %v1774_v26 = vmax.f32 %v1655_v22, 0.0 }
 0x384   : > { %v1823_v27 = vpack.c.bf16 %v1773_v24, %v1771_v23 }
 0x385   : > { %v1824_v28 = vpack.c.bf16 %v1774_v26, %v1772_v25  ;;  %v1658_v29 = vpop.f32.mrb[92].mxu0 }
 0x386   : > { %v1659_v30 = vadd.f32 %v1658_v29, %v3917_v58  ;;  %v1660_v31 = vpop.f32.mrb[93].mxu0 }
 0x387   : > { %v1661_v32 = vadd.f32 %v1660_v31, %v3920_v44  ;;  %v1662_v33 = vpop.f32.mrb[94].mxu0  ;;  %2058 = vmatprep.mubr.bf16.mxu1 %v1824_v28 }
 0x388   : > { %v1663_v34 = vadd.f32 %v1662_v33, %v3917_v58  ;;  %v1664_v35 = vpop.f32.mrb[95].mxu0  ;;  %2059 = vmatmul.mubr.bf16.gmra.mrb[80].mxu1 %v1823_v27  ;;  %v1775_v37 = vmax.f32 %v1659_v30, 0.0 }
 0x389   : > { %v1665_v36 = vadd.f32 %v1664_v35, %v3920_v44  ;;  %v1776_v39 = vmax.f32 %v1661_v32, 0.0 }
 0x38a   : > { %v1777_v38 = vmax.f32 %v1663_v34, 0.0 }
 0x38b   : > { %v1778_v0 = vmax.f32 %v1665_v36, 0.0 }
 0x38c   : > { %v1825_v42 = vpack.c.bf16 %v1777_v38, %v1775_v37 }
 0x38d   : > { %v1826_v43 = vpack.c.bf16 %v1778_v0, %v1776_v39  ;;  %v1668_v46 = vpop.f32.mrb[96].mxu0 }
 0x38e   : > { %v1669_v47 = vadd.f32 %v1668_v46, %v3917_v58  ;;  %v1670_v48 = vpop.f32.mrb[97].mxu0 }
 0x38f   : > { %v1671_v49 = vadd.f32 %v1670_v48, %v3920_v44  ;;  %v1672_v50 = vpop.f32.mrb[98].mxu0  ;;  %2066 = vmatprep.mubr.bf16.mxu1 %v1826_v43 }
 0x390   : > { %v1673_v51 = vadd.f32 %v1672_v50, %v3917_v58  ;;  %v1674_v52 = vpop.f32.mrb[99].mxu0  ;;  %2067 = vmatmul.mubr.bf16.gmra.mrb[84].mxu1 %v1825_v42  ;;  %v1779_v54 = vmax.f32 %v1669_v47, 0.0 }
 0x391   : > { %v1675_v53 = vadd.f32 %v1674_v52, %v3920_v44  ;;  %v1780_v56 = vmax.f32 %v1671_v49, 0.0 }
 0x392   : > { %v1781_v55 = vmax.f32 %v1673_v51, 0.0 }
 0x393   : > { %v1782_v57 = vmax.f32 %v1675_v53, 0.0 }
 0x394   : > { %v1827_v59 = vpack.c.bf16 %v1781_v55, %v1779_v54 }
 0x395   : > { %v1828_v45 = vpack.c.bf16 %v1782_v57, %v1780_v56  ;;  %v1678_v60 = vpop.f32.mrb[100].mxu0 }
 0x396   : > { %v1679_v61 = vadd.f32 %v1678_v60, %v3917_v58  ;;  %v1680_v62 = vpop.f32.mrb[101].mxu0 }
 0x397   : > { %v1681_v63 = vadd.f32 %v1680_v62, %v3920_v44  ;;  %v1682_v1 = vpop.f32.mrb[102].mxu0  ;;  %2074 = vmatprep.mubr.bf16.mxu1 %v1828_v45 }
 0x398   : > { %v1683_v2 = vadd.f32 %v1682_v1, %v3917_v58  ;;  %v1684_v3 = vpop.f32.mrb[103].mxu0  ;;  %2075 = vmatmul.mubr.bf16.gmra.mrb[88].mxu1 %v1827_v59  ;;  %v1783_v5 = vmax.f32 %v1679_v61, 0.0 }
 0x399   : > { %v1685_v4 = vadd.f32 %v1684_v3, %v3920_v44  ;;  %v1784_v6 = vmax.f32 %v1681_v63, 0.0 }
 0x39a   : > { %v1785_v40 = vmax.f32 %v1683_v2, 0.0 }
 0x39b   : > { %v1786_v7 = vmax.f32 %v1685_v4, 0.0 }
 0x39c   : > { %v1829_v41 = vpack.c.bf16 %v1785_v40, %v1783_v5 }
 0x39d   : > { %v1830_v8 = vpack.c.bf16 %v1786_v7, %v1784_v6  ;;  %v1688_v9 = vpop.f32.mrb[104].mxu0 }
 0x39e   : > { %v1689_v10 = vadd.f32 %v1688_v9, %v3917_v58  ;;  %v1690_v11 = vpop.f32.mrb[105].mxu0 }
 0x39f   : > { %v1691_v12 = vadd.f32 %v1690_v11, %v3920_v44  ;;  %v1692_v13 = vpop.f32.mrb[106].mxu0  ;;  %2082 = vmatprep.mubr.bf16.mxu1 %v1830_v8 }
 0x3a0   : > { %v1693_v14 = vadd.f32 %v1692_v13, %v3917_v58  ;;  %v1694_v15 = vpop.f32.mrb[107].mxu0  ;;  %2083 = vmatmul.mubr.bf16.gmra.mrb[92].mxu1 %v1829_v41  ;;  %v1787_v17 = vmax.f32 %v1689_v10, 0.0 }
 0x3a1   : > { %v1695_v16 = vadd.f32 %v1694_v15, %v3920_v44  ;;  %v1788_v19 = vmax.f32 %v1691_v12, 0.0 }
 0x3a2   : > { %v1789_v18 = vmax.f32 %v1693_v14, 0.0 }
 0x3a3   : > { %v1790_v20 = vmax.f32 %v1695_v16, 0.0 }
 0x3a4   : > { %v1831_v21 = vpack.c.bf16 %v1789_v18, %v1787_v17 }
 0x3a5   : > { %v1832_v22 = vpack.c.bf16 %v1790_v20, %v1788_v19  ;;  %v1698_v23 = vpop.f32.mrb[108].mxu0 }
 0x3a6   : > { %v1699_v24 = vadd.f32 %v1698_v23, %v3917_v58  ;;  %v1700_v25 = vpop.f32.mrb[109].mxu0 }
 0x3a7   : > { %v1701_v26 = vadd.f32 %v1700_v25, %v3920_v44  ;;  %v1702_v27 = vpop.f32.mrb[110].mxu0  ;;  %2090 = vmatprep.mubr.bf16.mxu1 %v1832_v22 }
 0x3a8   : > { %v1703_v28 = vadd.f32 %v1702_v27, %v3917_v58  ;;  %v1704_v29 = vpop.f32.mrb[111].mxu0  ;;  %2091 = vmatmul.mubr.bf16.gmra.mrb[96].mxu1 %v1831_v21  ;;  %v1791_v31 = vmax.f32 %v1699_v24, 0.0 }
 0x3a9   : > { %v1705_v30 = vadd.f32 %v1704_v29, %v3920_v44  ;;  %v1792_v33 = vmax.f32 %v1701_v26, 0.0 }
 0x3aa   : > { %v1793_v32 = vmax.f32 %v1703_v28, 0.0 }
 0x3ab   : > { %v1794_v34 = vmax.f32 %v1705_v30, 0.0 }
 0x3ac   : > { %v1833_v35 = vpack.c.bf16 %v1793_v32, %v1791_v31 }
 0x3ad   : > { %v1834_v36 = vpack.c.bf16 %v1794_v34, %v1792_v33  ;;  %v1708_v37 = vpop.f32.mrb[112].mxu0  ;;  %v3989_v33 = vld [vmem:[%s4374_s8] ss:$0 sm:$0xff] }
 0x3ae   : > { %v1709_v38 = vadd.f32 %v1708_v37, %v3917_v58  ;;  %v1710_v39 = vpop.f32.mrb[113].mxu0 }
 0x3af   : > { %v1711_v0 = vadd.f32 %v1710_v39, %v3920_v44  ;;  %v1712_v42 = vpop.f32.mrb[114].mxu0  ;;  %2098 = vmatprep.mubr.bf16.mxu1 %v1834_v36 }
 0x3b0   : > { %v1713_v43 = vadd.f32 %v1712_v42, %v3917_v58  ;;  %v1714_v46 = vpop.f32.mrb[115].mxu0  ;;  %2099 = vmatmul.mubr.bf16.gmra.mrb[100].mxu1 %v1833_v35  ;;  %v1795_v48 = vmax.f32 %v1709_v38, 0.0 }
 0x3b1   : > { %v1715_v47 = vadd.f32 %v1714_v46, %v3920_v44  ;;  %v1796_v50 = vmax.f32 %v1711_v0, 0.0 }
 0x3b2   : > { %v1797_v49 = vmax.f32 %v1713_v43, 0.0 }
 0x3b3   : > { %v1798_v51 = vmax.f32 %v1715_v47, 0.0 }
 0x3b4   : > { %v1835_v52 = vpack.c.bf16 %v1797_v49, %v1795_v48 }
 0x3b5   : > { %v1836_v53 = vpack.c.bf16 %v1798_v51, %v1796_v50  ;;  %v1718_v54 = vpop.f32.mrb[116].mxu0 }
 0x3b6   : > { %v1719_v55 = vadd.f32 %v1718_v54, %v3917_v58  ;;  %v1720_v56 = vpop.f32.mrb[117].mxu0 }
 0x3b7   : > { %v1721_v57 = vadd.f32 %v1720_v56, %v3920_v44  ;;  %v1722_v59 = vpop.f32.mrb[118].mxu0  ;;  %2106 = vmatprep.mubr.bf16.mxu1 %v1836_v53 }
 0x3b8   : > { %v1723_v45 = vadd.f32 %v1722_v59, %v3917_v58  ;;  %v1724_v60 = vpop.f32.mrb[119].mxu0  ;;  %2107 = vmatmul.mubr.bf16.gmra.mrb[104].mxu1 %v1835_v52  ;;  %v1799_v62 = vmax.f32 %v1719_v55, 0.0 }
 0x3b9   : > { %v1725_v61 = vadd.f32 %v1724_v60, %v3920_v44  ;;  %v1800_v1 = vmax.f32 %v1721_v57, 0.0 }
 0x3ba   : > { %v1801_v63 = vmax.f32 %v1723_v45, 0.0 }
 0x3bb   : > { %v1802_v2 = vmax.f32 %v1725_v61, 0.0 }
 0x3bc   : > { %v1837_v3 = vpack.c.bf16 %v1801_v63, %v1799_v62 }
 0x3bd   : > { %v1838_v4 = vpack.c.bf16 %v1802_v2, %v1800_v1  ;;  %v1728_v5 = vpop.f32.mrb[120].mxu0 }
 0x3be   : > { %v1729_v40 = vadd.f32 %v1728_v5, %v3917_v58  ;;  %v1730_v6 = vpop.f32.mrb[121].mxu0 }
 0x3bf   : > { %v1731_v7 = vadd.f32 %v1730_v6, %v3920_v44  ;;  %v1732_v41 = vpop.f32.mrb[122].mxu0  ;;  %2114 = vmatprep.mubr.bf16.mxu1 %v1838_v4 }
 0x3c0   : > { %v1733_v8 = vadd.f32 %v1732_v41, %v3917_v58  ;;  %v1734_v9 = vpop.f32.mrb[123].mxu0  ;;  %2115 = vmatmul.mubr.bf16.gmra.mrb[108].mxu1 %v1837_v3  ;;  %v1803_v11 = vmax.f32 %v1729_v40, 0.0 }
 0x3c1   : > { %v1735_v10 = vadd.f32 %v1734_v9, %v3920_v44  ;;  %v1804_v13 = vmax.f32 %v1731_v7, 0.0 }
 0x3c2   : > { %v1805_v12 = vmax.f32 %v1733_v8, 0.0 }
 0x3c3   : > { %v1806_v14 = vmax.f32 %v1735_v10, 0.0 }
 0x3c4   : > { %v1839_v15 = vpack.c.bf16 %v1805_v12, %v1803_v11 }
 0x3c5   : > { %v1840_v16 = vpack.c.bf16 %v1806_v14, %v1804_v13  ;;  %v1738_v17 = vpop.f32.mrb[124].mxu0 }
 0x3c6   : > { %v1739_v18 = vadd.f32 %v1738_v17, %v3917_v58  ;;  %v1740_v19 = vpop.f32.mrb[125].mxu0 }
 0x3c7   : > { %v1741_v20 = vadd.f32 %v1740_v19, %v3920_v44  ;;  %v1742_v21 = vpop.f32.mrb[126].mxu0  ;;  %2122 = vmatprep.mubr.bf16.mxu1 %v1840_v16 }
 0x3c8   : > { %v1743_v22 = vadd.f32 %v1742_v21, %v3917_v58  ;;  %v1744_v23 = vpop.f32.mrb[127].mxu0  ;;  %2123 = vmatmul.mubr.bf16.gmra.mrb[112].mxu1 %v1839_v15  ;;  %v1807_v25 = vmax.f32 %v1739_v18, 0.0 }
 0x3c9   : > { %v1745_v24 = vadd.f32 %v1744_v23, %v3920_v44  ;;  %v1808_v27 = vmax.f32 %v1741_v20, 0.0 }
 0x3ca   : > { %v1809_v26 = vmax.f32 %v1743_v22, 0.0 }
 0x3cb   : > { %v1810_v28 = vmax.f32 %v1745_v24, 0.0 }
 0x3cc   : > { %v1841_v29 = vpack.c.bf16 %v1809_v26, %v1807_v25 }
 0x3cd   : > { %v1842_v30 = vpack.c.bf16 %v1810_v28, %v1808_v27 }
 0x3cf   : > { %2130 = vmatprep.mubr.bf16.mxu1 %v1842_v30 }
 0x3d0   : > { %2131 = vmatmul.mubr.bf16.gmra.mrb[116].mxu1 %v1841_v29 }
 0x42b   : > { %v2721_v31 = vpop.f32.mrb[128].mxu0 }
 0x42c   : > { %v2722_v32 = vpop.f32.mrb[129].mxu0 }
 0x42d   : > { %v2723_v58 = vadd.f32 %v2722_v32, %v2721_v31  ;;  %v2724_v34 = vpop.f32.mrb[130].mxu0 }
 0x42e   : > { %v2725_v35 = vpop.f32.mrb[131].mxu0 }
 0x42f   : > { %v2726_v36 = vadd.f32 %v2725_v35, %v2724_v34  ;;  %v3992_v44 = vadd.f32 %v2723_v58, %v3989_v33 }
 0x431   : > { %2139 = vmax.xlane.f32.xlu0 %v3992_v44  ;;  %v3996_v38 = vadd.f32 %v2726_v36, %v3989_v33 }
 0x433   : > { %v2727_v37 = vpop.f32.mrb[132].mxu0 }
 0x434   : > { %v2728_v39 = vpop.f32.mrb[133].mxu0 }
 0x435   : > { %v2729_v0 = vadd.f32 %v2728_v39, %v2727_v37  ;;  %v2730_v42 = vpop.f32.mrb[134].mxu0  ;;  %2141 = vmax.xlane.f32.xlu0 %v3996_v38 }
 0x436   : > { %v2731_v43 = vpop.f32.mrb[135].mxu0 }
 0x437   : > { %v2732_v46 = vadd.f32 %v2731_v43, %v2730_v42  ;;  %v4000_v47 = vadd.f32 %v2729_v0, %v3989_v33 }
 0x439   : > { %2143 = vmax.xlane.f32.xlu1 %v4000_v47  ;;  %v4004_v49 = vadd.f32 %v2732_v46, %v3989_v33 }
 0x43b   : > { %v2733_v48 = vpop.f32.mrb[64].mxu1 }
 0x43c   : > { %v2734_v50 = vpop.f32.mrb[65].mxu1 }
 0x43d   : > { %v2735_v51 = vadd.f32 %v2734_v50, %v2733_v48  ;;  %v2736_v52 = vpop.f32.mrb[66].mxu1  ;;  %2145 = vmax.xlane.f32.xlu1 %v4004_v49 }
 0x43e   : > { %v2737_v53 = vpop.f32.mrb[67].mxu1 }
 0x43f   : > { %v2738_v54 = vadd.f32 %v2737_v53, %v2736_v52  ;;  %v4008_v55 = vadd.f32 %v2735_v51, %v3989_v33 }
 0x441   : > { %2147 = vmax.xlane.f32.xlu0 %v4008_v55  ;;  %v4012_v56 = vadd.f32 %v2738_v54, %v3989_v33 }
 0x443   : > { %v2739_v57 = vpop.f32.mrb[68].mxu1  ;;  %2149 = vmax.xlane.f32.xlu1 %v4012_v56 }
 0x444   : > { %v2740_v59 = vpop.f32.mrb[69].mxu1 }
 0x445   : > { %v2741_v45 = vadd.f32 %v2740_v59, %v2739_v57  ;;  %v2742_v60 = vpop.f32.mrb[70].mxu1 }
 0x446   : > { %v2743_v61 = vpop.f32.mrb[71].mxu1 }
 0x447   : > { %v2744_v62 = vadd.f32 %v2743_v61, %v2742_v60  ;;  %v4016_v63 = vadd.f32 %v2741_v45, %v3989_v33 }
 0x449   : > { %2151 = vmax.xlane.f32.xlu0 %v4016_v63  ;;  %v4020_v1 = vadd.f32 %v2744_v62, %v3989_v33 }
 0x44b   : > { %v2745_v2 = vpop.f32.mrb[72].mxu1  ;;  %2153 = vmax.xlane.f32.xlu1 %v4020_v1 }
 0x44c   : > { %v2746_v3 = vpop.f32.mrb[73].mxu1 }
 0x44d   : > { %v2747_v4 = vadd.f32 %v2746_v3, %v2745_v2  ;;  %v2748_v5 = vpop.f32.mrb[74].mxu1 }
 0x44e   : > { %v2749_v40 = vpop.f32.mrb[75].mxu1 }
 0x44f   : > { %v2750_v6 = vadd.f32 %v2749_v40, %v2748_v5  ;;  %v4024_v7 = vadd.f32 %v2747_v4, %v3989_v33 }
 0x451   : > { %2155 = vmax.xlane.f32.xlu0 %v4024_v7  ;;  %v4028_v41 = vadd.f32 %v2750_v6, %v3989_v33 }
 0x453   : > { %v2751_v8 = vpop.f32.mrb[76].mxu1  ;;  %2157 = vmax.xlane.f32.xlu1 %v4028_v41 }
 0x454   : > { %v2752_v9 = vpop.f32.mrb[77].mxu1 }
 0x455   : > { %v2753_v10 = vadd.f32 %v2752_v9, %v2751_v8  ;;  %v2754_v11 = vpop.f32.mrb[78].mxu1 }
 0x456   : > { %v2755_v12 = vpop.f32.mrb[79].mxu1 }
 0x457   : > { %v2756_v13 = vadd.f32 %v2755_v12, %v2754_v11  ;;  %v4032_v14 = vadd.f32 %v2753_v10, %v3989_v33 }
 0x459   : > { %2159 = vmax.xlane.f32.xlu0 %v4032_v14  ;;  %v4036_v15 = vadd.f32 %v2756_v13, %v3989_v33 }
 0x45b   : > { %v2757_v16 = vpop.f32.mrb[80].mxu1  ;;  %2161 = vmax.xlane.f32.xlu1 %v4036_v15 }
 0x45c   : > { %v2758_v17 = vpop.f32.mrb[81].mxu1 }
 0x45d   : > { %v2759_v18 = vadd.f32 %v2758_v17, %v2757_v16  ;;  %v2760_v19 = vpop.f32.mrb[82].mxu1 }
 0x45e   : > { %v2761_v20 = vpop.f32.mrb[83].mxu1 }
 0x45f   : > { %v2762_v21 = vadd.f32 %v2761_v20, %v2760_v19  ;;  %v4040_v22 = vadd.f32 %v2759_v18, %v3989_v33 }
 0x461   : > { %2163 = vmax.xlane.f32.xlu0 %v4040_v22  ;;  %v4044_v23 = vadd.f32 %v2762_v21, %v3989_v33 }
 0x463   : > { %v2763_v24 = vpop.f32.mrb[84].mxu1  ;;  %2165 = vmax.xlane.f32.xlu1 %v4044_v23 }
 0x464   : > { %v2764_v25 = vpop.f32.mrb[85].mxu1 }
 0x465   : > { %v2765_v26 = vadd.f32 %v2764_v25, %v2763_v24  ;;  %v2766_v27 = vpop.f32.mrb[86].mxu1 }
 0x466   : > { %v2767_v28 = vpop.f32.mrb[87].mxu1 }
 0x467   : > { %v2768_v29 = vadd.f32 %v2767_v28, %v2766_v27  ;;  %v4048_v30 = vadd.f32 %v2765_v26, %v3989_v33 }
 0x469   : > { %2167 = vmax.xlane.f32.xlu0 %v4048_v30  ;;  %v4052_v31 = vadd.f32 %v2768_v29, %v3989_v33 }
 0x46b   : > { %v2769_v32 = vpop.f32.mrb[88].mxu1  ;;  %2169 = vmax.xlane.f32.xlu1 %v4052_v31 }
 0x46c   : > { %v2770_v58 = vpop.f32.mrb[89].mxu1 }
 0x46d   : > { %v2771_v34 = vadd.f32 %v2770_v58, %v2769_v32  ;;  %v2772_v35 = vpop.f32.mrb[90].mxu1 }
 0x46e   : > { %v2773_v36 = vpop.f32.mrb[91].mxu1 }
 0x46f   : > { %v2774_v37 = vadd.f32 %v2773_v36, %v2772_v35  ;;  %v4056_v39 = vadd.f32 %v2771_v34, %v3989_v33 }
 0x471   : > { %2171 = vmax.xlane.f32.xlu0 %v4056_v39  ;;  %v4060_v0 = vadd.f32 %v2774_v37, %v3989_v33 }
 0x473   : > { %v2775_v42 = vpop.f32.mrb[92].mxu1  ;;  %2173 = vmax.xlane.f32.xlu1 %v4060_v0 }
 0x474   : > { %v2776_v43 = vpop.f32.mrb[93].mxu1 }
 0x475   : > { %v2777_v46 = vadd.f32 %v2776_v43, %v2775_v42  ;;  %v2778_v48 = vpop.f32.mrb[94].mxu1 }
 0x476   : > { %v2779_v50 = vpop.f32.mrb[95].mxu1 }
 0x477   : > { %v2780_v51 = vadd.f32 %v2779_v50, %v2778_v48  ;;  %v4064_v52 = vadd.f32 %v2777_v46, %v3989_v33 }
 0x479   : > { %2175 = vmax.xlane.f32.xlu0 %v4064_v52  ;;  %v4068_v53 = vadd.f32 %v2780_v51, %v3989_v33 }
 0x47b   : > { %v2781_v54 = vpop.f32.mrb[96].mxu1  ;;  %2177 = vmax.xlane.f32.xlu1 %v4068_v53 }
 0x47c   : > { %v2782_v57 = vpop.f32.mrb[97].mxu1 }
 0x47d   : > { %v2783_v59 = vadd.f32 %v2782_v57, %v2781_v54  ;;  %v2784_v45 = vpop.f32.mrb[98].mxu1 }
 0x47e   : > { %v2785_v60 = vpop.f32.mrb[99].mxu1 }
 0x47f   : > { %v2786_v61 = vadd.f32 %v2785_v60, %v2784_v45  ;;  %v4072_v62 = vadd.f32 %v2783_v59, %v3989_v33 }
 0x481   : > { %2179 = vmax.xlane.f32.xlu0 %v4072_v62  ;;  %v4076_v2 = vadd.f32 %v2786_v61, %v3989_v33 }
 0x483   : > { %v2787_v3 = vpop.f32.mrb[100].mxu1  ;;  %2181 = vmax.xlane.f32.xlu1 %v4076_v2 }
 0x484   : > { %v2788_v4 = vpop.f32.mrb[101].mxu1 }
 0x485   : > { %v2789_v5 = vadd.f32 %v2788_v4, %v2787_v3  ;;  %v2790_v40 = vpop.f32.mrb[102].mxu1 }
 0x486   : > { %v2791_v6 = vpop.f32.mrb[103].mxu1 }
 0x487   : > { %v2792_v8 = vadd.f32 %v2791_v6, %v2790_v40  ;;  %v4080_v9 = vadd.f32 %v2789_v5, %v3989_v33 }
 0x489   : > { %2183 = vmax.xlane.f32.xlu0 %v4080_v9  ;;  %v4084_v10 = vadd.f32 %v2792_v8, %v3989_v33 }
 0x48b   : > { %v2793_v11 = vpop.f32.mrb[104].mxu1  ;;  %2185 = vmax.xlane.f32.xlu1 %v4084_v10 }
 0x48c   : > { %v2794_v12 = vpop.f32.mrb[105].mxu1 }
 0x48d   : > { %v2795_v13 = vadd.f32 %v2794_v12, %v2793_v11  ;;  %v2796_v16 = vpop.f32.mrb[106].mxu1 }
 0x48e   : > { %v2797_v17 = vpop.f32.mrb[107].mxu1 }
 0x48f   : > { %v2798_v18 = vadd.f32 %v2797_v17, %v2796_v16  ;;  %v4088_v19 = vadd.f32 %v2795_v13, %v3989_v33 }
 0x491   : > { %2187 = vmax.xlane.f32.xlu0 %v4088_v19  ;;  %v4092_v20 = vadd.f32 %v2798_v18, %v3989_v33 }
 0x493   : > { %v2799_v21 = vpop.f32.mrb[108].mxu1  ;;  %2189 = vmax.xlane.f32.xlu1 %v4092_v20 }
 0x494   : > { %v2800_v24 = vpop.f32.mrb[109].mxu1 }
 0x495   : > { %v2801_v25 = vadd.f32 %v2800_v24, %v2799_v21  ;;  %v2802_v26 = vpop.f32.mrb[110].mxu1 }
 0x496   : > { %v2803_v27 = vpop.f32.mrb[111].mxu1 }
 0x497   : > { %v2804_v28 = vadd.f32 %v2803_v27, %v2802_v26  ;;  %v4096_v29 = vadd.f32 %v2801_v25, %v3989_v33 }
 0x499   : > { %2191 = vmax.xlane.f32.xlu0 %v4096_v29  ;;  %v4100_v32 = vadd.f32 %v2804_v28, %v3989_v33 }
 0x49b   : > { %v2805_v58 = vpop.f32.mrb[112].mxu1  ;;  %2193 = vmax.xlane.f32.xlu1 %v4100_v32 }
 0x49c   : > { %v2806_v34 = vpop.f32.mrb[113].mxu1 }
 0x49d   : > { %v2807_v35 = vadd.f32 %v2806_v34, %v2805_v58  ;;  %v2808_v36 = vpop.f32.mrb[114].mxu1 }
 0x49e   : > { %v2809_v37 = vpop.f32.mrb[115].mxu1 }
 0x49f   : > { %v2810_v42 = vadd.f32 %v2809_v37, %v2808_v36  ;;  %v4104_v43 = vadd.f32 %v2807_v35, %v3989_v33 }
 0x4a1   : > { %2195 = vmax.xlane.f32.xlu0 %v4104_v43  ;;  %v4108_v46 = vadd.f32 %v2810_v42, %v3989_v33 }
 0x4a3   : > { %v2811_v48 = vpop.f32.mrb[116].mxu1  ;;  %2197 = vmax.xlane.f32.xlu1 %v4108_v46 }
 0x4a4   : > { %v2812_v50 = vpop.f32.mrb[117].mxu1 }
 0x4a5   : > { %v2813_v51 = vadd.f32 %v2812_v50, %v2811_v48  ;;  %v2814_v54 = vpop.f32.mrb[118].mxu1 }
 0x4a6   : > { %v2815_v57 = vpop.f32.mrb[119].mxu1 }
 0x4a7   : > { %v2816_v59 = vadd.f32 %v2815_v57, %v2814_v54  ;;  %v4112_v45 = vadd.f32 %v2813_v51, %v3989_v33 }
 0x4a9   : > { %2199 = vmax.xlane.f32.xlu0 %v4112_v45  ;;  %v4116_v60 = vadd.f32 %v2816_v59, %v3989_v33 }
 0x4ab   : > { %2201 = vmax.xlane.f32.xlu1 %v4116_v60 }
 0x4be   : > { %v2140_v61 = vpop.xlane.xlu0 %2139 }
 0x4bf   : > { %v2203_v3 = vsub.f32 %v3992_v44, %v2140_v61 }
 0x4c1   : > { %v2235_v4 = vmul.f32 1.442695, %v2203_v3 }
 0x4c2   : > { %v2142_v5 = vpop.xlane.xlu0 %2141 }
 0x4c3   : > { %3063 = vpow2.f32 %v2235_v4  ;;  %v2204_v40 = vsub.f32 %v3996_v38, %v2142_v5 }
 0x4c5   : > { %v2237_v6 = vmul.f32 1.442695, %v2204_v40 }
 0x4c6   : > { %v2144_v8 = vpop.xlane.xlu1 %2143 }
 0x4c7   : > { %3065 = vpow2.f32 %v2237_v6  ;;  %v2205_v11 = vsub.f32 %v4000_v47, %v2144_v8 }
 0x4c9   : > { %v2239_v12 = vmul.f32 1.442695, %v2205_v11 }
 0x4ca   : > { %v2146_v13 = vpop.xlane.xlu1 %2145 }
 0x4cb   : > { %3067 = vpow2.f32 %v2239_v12  ;;  %v2206_v33 = vsub.f32 %v4004_v49, %v2146_v13 }
 0x4cd   : > { %v4123_v16 = vpop.eup %3063  ;;  %v2241_v17 = vmul.f32 1.442695, %v2206_v33 }
 0x4ce   : > { %2299 = vadd.xlane.f32.xlu0 %v4123_v16  ;;  %v2148_v44 = vpop.xlane.xlu0 %2147 }
 0x4cf   : > { %3069 = vpow2.f32 %v2241_v17  ;;  %v2207_v18 = vsub.f32 %v4008_v55, %v2148_v44 }
 0x4d0   : > { %v2150_v38 = vpop.xlane.xlu1 %2149 }
 0x4d1   : > { %v4127_v21 = vpop.eup %3065  ;;  %v2243_v24 = vmul.f32 1.442695, %v2207_v18  ;;  %v2208_v47 = vsub.f32 %v4012_v56, %v2150_v38 }
 0x4d2   : > { %2301 = vadd.xlane.f32.xlu1 %v4127_v21 }
 0x4d3   : > { %3071 = vpow2.f32 %v2243_v24  ;;  %v2245_v25 = vmul.f32 1.442695, %v2208_v47 }
 0x4d5   : > { %v4131_v49 = vpop.eup %3067  ;;  %3073 = vpow2.f32 %v2245_v25 }
 0x4d6   : > { %2303 = vadd.xlane.f32.xlu0 %v4131_v49  ;;  %v2152_v26 = vpop.xlane.xlu0 %2151 }
 0x4d7   : > { %v2209_v27 = vsub.f32 %v4016_v63, %v2152_v26 }
 0x4d8   : > { %v2154_v28 = vpop.xlane.xlu1 %2153 }
 0x4d9   : > { %v4135_v55 = vpop.eup %3069  ;;  %v2247_v58 = vmul.f32 1.442695, %v2209_v27  ;;  %v2210_v34 = vsub.f32 %v4020_v1, %v2154_v28 }
 0x4da   : > { %2305 = vadd.xlane.f32.xlu1 %v4135_v55 }
 0x4db   : > { %3075 = vpow2.f32 %v2247_v58  ;;  %v2249_v56 = vmul.f32 1.442695, %v2210_v34 }
 0x4dd   : > { %v4139_v35 = vpop.eup %3071  ;;  %3077 = vpow2.f32 %v2249_v56 }
 0x4de   : > { %2307 = vadd.xlane.f32.xlu0 %v4139_v35  ;;  %v2156_v36 = vpop.xlane.xlu0 %2155 }
 0x4df   : > { %v4142_v37 = vpop.eup %3073  ;;  %v2211_v63 = vsub.f32 %v4024_v7, %v2156_v36 }
 0x4e0   : > { %v2158_v42 = vpop.xlane.xlu1 %2157  ;;  %2309 = vadd.xlane.f32.xlu1 %v4142_v37 }
 0x4e1   : > { %v2251_v48 = vmul.f32 1.442695, %v2211_v63  ;;  %v2212_v1 = vsub.f32 %v4028_v41, %v2158_v42 }
 0x4e3   : > { %3079 = vpow2.f32 %v2251_v48  ;;  %v2253_v50 = vmul.f32 1.442695, %v2212_v1 }
 0x4e5   : > { %v4147_v51 = vpop.eup %3075  ;;  %3081 = vpow2.f32 %v2253_v50 }
 0x4e6   : > { %2311 = vadd.xlane.f32.xlu0 %v4147_v51  ;;  %v2160_v54 = vpop.xlane.xlu0 %2159 }
 0x4e7   : > { %v4150_v57 = vpop.eup %3077  ;;  %v2213_v59 = vsub.f32 %v4032_v14, %v2160_v54 }
 0x4e8   : > { %v2162_v61 = vpop.xlane.xlu1 %2161  ;;  %2313 = vadd.xlane.f32.xlu1 %v4150_v57 }
 0x4e9   : > { %v2255_v7 = vmul.f32 1.442695, %v2213_v59  ;;  %v2214_v3 = vsub.f32 %v4036_v15, %v2162_v61 }
 0x4eb   : > { %3083 = vpow2.f32 %v2255_v7  ;;  %v2257_v41 = vmul.f32 1.442695, %v2214_v3 }
 0x4ed   : > { %v4155_v4 = vpop.eup %3079  ;;  %3085 = vpow2.f32 %v2257_v41 }
 0x4ee   : > { %2315 = vadd.xlane.f32.xlu0 %v4155_v4  ;;  %v2164_v5 = vpop.xlane.xlu0 %2163 }
 0x4ef   : > { %v4158_v40 = vpop.eup %3081  ;;  %v2215_v6 = vsub.f32 %v4040_v22, %v2164_v5 }
 0x4f0   : > { %v2166_v8 = vpop.xlane.xlu1 %2165  ;;  %2317 = vadd.xlane.f32.xlu1 %v4158_v40 }
 0x4f1   : > { %v2259_v14 = vmul.f32 1.442695, %v2215_v6  ;;  %v2216_v11 = vsub.f32 %v4044_v23, %v2166_v8 }
 0x4f3   : > { %3087 = vpow2.f32 %v2259_v14  ;;  %v2261_v15 = vmul.f32 1.442695, %v2216_v11 }
 0x4f5   : > { %v4163_v12 = vpop.eup %3083  ;;  %3089 = vpow2.f32 %v2261_v15 }
 0x4f6   : > { %2319 = vadd.xlane.f32.xlu0 %v4163_v12  ;;  %v2168_v13 = vpop.xlane.xlu0 %2167 }
 0x4f7   : > { %v4166_v33 = vpop.eup %3085  ;;  %v2217_v17 = vsub.f32 %v4048_v30, %v2168_v13 }
 0x4f8   : > { %v2170_v44 = vpop.xlane.xlu1 %2169  ;;  %2321 = vadd.xlane.f32.xlu1 %v4166_v33 }
 0x4f9   : > { %v2263_v22 = vmul.f32 1.442695, %v2217_v17  ;;  %v2218_v18 = vsub.f32 %v4052_v31, %v2170_v44 }
 0x4fb   : > { %3091 = vpow2.f32 %v2263_v22  ;;  %v2265_v23 = vmul.f32 1.442695, %v2218_v18 }
 0x4fd   : > { %v4171_v38 = vpop.eup %3087  ;;  %3093 = vpow2.f32 %v2265_v23 }
 0x4fe   : > { %2323 = vadd.xlane.f32.xlu0 %v4171_v38  ;;  %v2172_v24 = vpop.xlane.xlu0 %2171 }
 0x4ff   : > { %v4174_v47 = vpop.eup %3089  ;;  %v2219_v25 = vsub.f32 %v4056_v39, %v2172_v24 }
 0x500   : > { %v2174_v26 = vpop.xlane.xlu1 %2173  ;;  %2325 = vadd.xlane.f32.xlu1 %v4174_v47 }
 0x501   : > { %v2267_v30 = vmul.f32 1.442695, %v2219_v25  ;;  %v2220_v27 = vsub.f32 %v4060_v0, %v2174_v26 }
 0x503   : > { %3095 = vpow2.f32 %v2267_v30  ;;  %v2269_v31 = vmul.f32 1.442695, %v2220_v27 }
 0x505   : > { %v4179_v28 = vpop.eup %3091  ;;  %3097 = vpow2.f32 %v2269_v31 }
 0x506   : > { %2327 = vadd.xlane.f32.xlu0 %v4179_v28  ;;  %v2176_v58 = vpop.xlane.xlu0 %2175 }
 0x507   : > { %v4182_v34 = vpop.eup %3093  ;;  %v2221_v56 = vsub.f32 %v4064_v52, %v2176_v58 }
 0x508   : > { %v2178_v36 = vpop.xlane.xlu1 %2177  ;;  %2329 = vadd.xlane.f32.xlu1 %v4182_v34 }
 0x509   : > { %v2271_v39 = vmul.f32 1.442695, %v2221_v56  ;;  %v2222_v63 = vsub.f32 %v4068_v53, %v2178_v36 }
 0x50b   : > { %3099 = vpow2.f32 %v2271_v39  ;;  %v2273_v0 = vmul.f32 1.442695, %v2222_v63 }
 0x50d   : > { %v4187_v42 = vpop.eup %3095  ;;  %3101 = vpow2.f32 %v2273_v0 }
 0x50e   : > { %2331 = vadd.xlane.f32.xlu0 %v4187_v42  ;;  %v2180_v48 = vpop.xlane.xlu0 %2179 }
 0x50f   : > { %v4190_v1 = vpop.eup %3097  ;;  %v2223_v50 = vsub.f32 %v4072_v62, %v2180_v48 }
 0x510   : > { %v2182_v54 = vpop.xlane.xlu1 %2181  ;;  %2333 = vadd.xlane.f32.xlu1 %v4190_v1 }
 0x511   : > { %v2275_v52 = vmul.f32 1.442695, %v2223_v50  ;;  %v2224_v59 = vsub.f32 %v4076_v2, %v2182_v54 }
 0x513   : > { %3103 = vpow2.f32 %v2275_v52  ;;  %v2277_v53 = vmul.f32 1.442695, %v2224_v59 }
 0x515   : > { %v4195_v61 = vpop.eup %3099  ;;  %3105 = vpow2.f32 %v2277_v53 }
 0x516   : > { %2335 = vadd.xlane.f32.xlu0 %v4195_v61  ;;  %v2184_v7 = vpop.xlane.xlu0 %2183 }
 0x517   : > { %v4198_v3 = vpop.eup %3101  ;;  %v2225_v41 = vsub.f32 %v4080_v9, %v2184_v7 }
 0x518   : > { %v2186_v5 = vpop.xlane.xlu1 %2185  ;;  %2337 = vadd.xlane.f32.xlu1 %v4198_v3 }
 0x519   : > { %v2279_v62 = vmul.f32 1.442695, %v2225_v41  ;;  %v2226_v6 = vsub.f32 %v4084_v10, %v2186_v5 }
 0x51b   : > { %3107 = vpow2.f32 %v2279_v62  ;;  %v2281_v2 = vmul.f32 1.442695, %v2226_v6 }
 0x51d   : > { %v4203_v8 = vpop.eup %3103  ;;  %3109 = vpow2.f32 %v2281_v2 }
 0x51e   : > { %2339 = vadd.xlane.f32.xlu0 %v4203_v8  ;;  %v2188_v14 = vpop.xlane.xlu0 %2187 }
 0x51f   : > { %v4206_v11 = vpop.eup %3105  ;;  %v2227_v15 = vsub.f32 %v4088_v19, %v2188_v14 }
 0x520   : > { %v2190_v13 = vpop.xlane.xlu1 %2189  ;;  %2341 = vadd.xlane.f32.xlu1 %v4206_v11 }
 0x521   : > { %v2283_v9 = vmul.f32 1.442695, %v2227_v15  ;;  %v2228_v17 = vsub.f32 %v4092_v20, %v2190_v13 }
 0x523   : > { %3111 = vpow2.f32 %v2283_v9  ;;  %v2285_v10 = vmul.f32 1.442695, %v2228_v17 }
 0x525   : > { %v4211_v44 = vpop.eup %3107  ;;  %3113 = vpow2.f32 %v2285_v10 }
 0x526   : > { %2343 = vadd.xlane.f32.xlu0 %v4211_v44  ;;  %v2192_v22 = vpop.xlane.xlu0 %2191 }
 0x527   : > { %v4214_v18 = vpop.eup %3109  ;;  %v2229_v23 = vsub.f32 %v4096_v29, %v2192_v22 }
 0x528   : > { %v2194_v24 = vpop.xlane.xlu1 %2193  ;;  %2345 = vadd.xlane.f32.xlu1 %v4214_v18 }
 0x529   : > { %v2287_v19 = vmul.f32 1.442695, %v2229_v23  ;;  %v2230_v25 = vsub.f32 %v4100_v32, %v2194_v24 }
 0x52b   : > { %3115 = vpow2.f32 %v2287_v19  ;;  %v2289_v20 = vmul.f32 1.442695, %v2230_v25 }
 0x52d   : > { %v4219_v26 = vpop.eup %3111  ;;  %3117 = vpow2.f32 %v2289_v20 }
 0x52e   : > { %2347 = vadd.xlane.f32.xlu0 %v4219_v26  ;;  %v2196_v30 = vpop.xlane.xlu0 %2195 }
 0x52f   : > { %v4222_v27 = vpop.eup %3113  ;;  %v2231_v31 = vsub.f32 %v4104_v43, %v2196_v30 }
 0x530   : > { %v2198_v58 = vpop.xlane.xlu1 %2197  ;;  %2349 = vadd.xlane.f32.xlu1 %v4222_v27 }
 0x531   : > { %v2291_v29 = vmul.f32 1.442695, %v2231_v31  ;;  %v2232_v56 = vsub.f32 %v4108_v46, %v2198_v58 }
 0x533   : > { %3119 = vpow2.f32 %v2291_v29  ;;  %v2293_v32 = vmul.f32 1.442695, %v2232_v56 }
 0x535   : > { %v4227_v36 = vpop.eup %3115  ;;  %3121 = vpow2.f32 %v2293_v32 }
 0x536   : > { %2351 = vadd.xlane.f32.xlu0 %v4227_v36  ;;  %v2200_v39 = vpop.xlane.xlu0 %2199 }
 0x537   : > { %v4230_v63 = vpop.eup %3117  ;;  %v2233_v0 = vsub.f32 %v4112_v45, %v2200_v39 }
 0x538   : > { %v2202_v48 = vpop.xlane.xlu1 %2201  ;;  %2353 = vadd.xlane.f32.xlu1 %v4230_v63 }
 0x539   : > { %v2295_v43 = vmul.f32 1.442695, %v2233_v0  ;;  %v2234_v50 = vsub.f32 %v4116_v60, %v2202_v48 }
 0x53b   : > { %3123 = vpow2.f32 %v2295_v43  ;;  %v2297_v46 = vmul.f32 1.442695, %v2234_v50 }
 0x53d   : > { %v4235_v54 = vpop.eup %3119  ;;  %3125 = vpow2.f32 %v2297_v46 }
 0x53e   : > { %2355 = vadd.xlane.f32.xlu0 %v4235_v54 }
 0x53f   : > { %v4238_v52 = vpop.eup %3121 }
 0x540   : > { %2357 = vadd.xlane.f32.xlu1 %v4238_v52 }
 0x545   : > { %v4241_v59 = vpop.eup %3123 }
 0x546   : > { %2359 = vadd.xlane.f32.xlu0 %v4241_v59 }
 0x547   : > { %v4244_v45 = vpop.eup %3125 }
 0x548   : > { %2361 = vadd.xlane.f32.xlu1 %v4244_v45 }
 0x55b   : > { %v2300_v60 = vpop.xlane.xlu0 %2299 }
 0x55c   : > { %3127 = vrcp.f32 %v2300_v60 }
 0x55f   : > { %v2302_v53 = vpop.xlane.xlu1 %2301 }
 0x560   : > { %3129 = vrcp.f32 %v2302_v53 }
 0x563   : > { %v2304_v7 = vpop.xlane.xlu0 %2303 }
 0x564   : > { %3131 = vrcp.f32 %v2304_v7 }
 0x566   : > { %v3128_v41 = vpop.eup %3127 }
 0x567   : > { %v2364_v5 = vmul.f32 %v3128_v41, %v4123_v16  ;;  %v2306_v62 = vpop.xlane.xlu1 %2305 }
 0x568   : > { %3133 = vrcp.f32 %v2306_v62 }
 0x569   : > { %2427 = vst [vmem:[%s4250_s23] sm:$0xff] %v2364_v5 }
 0x56a   : > { %v3130_v6 = vpop.eup %3129 }
 0x56b   : > { %v2366_v2 = vmul.f32 %v3130_v6, %v4127_v21  ;;  %v2308_v14 = vpop.xlane.xlu0 %2307 }
 0x56c   : > { %3135 = vrcp.f32 %v2308_v14 }
 0x56d   : > { %2428 = vst [vmem:[%s4250_s23 + $0x8] sm:$0xff] %v2366_v2  ;;  %v2310_v15 = vpop.xlane.xlu1 %2309 }
 0x56e   : > { %v3132_v13 = vpop.eup %3131  ;;  %3137 = vrcp.f32 %v2310_v15 }
 0x56f   : > { %v2368_v16 = vmul.f32 %v3132_v13, %v4131_v49 }
 0x571   : > { %2429 = vst [vmem:[%s4250_s23 + $0x10] sm:$0xff] %v2368_v16 }
 0x572   : > { %v3134_v9 = vpop.eup %3133 }
 0x573   : > { %v2370_v17 = vmul.f32 %v3134_v9, %v4135_v55  ;;  %v2312_v10 = vpop.xlane.xlu0 %2311 }
 0x574   : > { %3139 = vrcp.f32 %v2312_v10 }
 0x575   : > { %2430 = vst [vmem:[%s4250_s23 + $0x18] sm:$0xff] %v2370_v17  ;;  %v2314_v22 = vpop.xlane.xlu1 %2313 }
 0x576   : > { %v3136_v21 = vpop.eup %3135  ;;  %3141 = vrcp.f32 %v2314_v22 }
 0x577   : > { %v2372_v23 = vmul.f32 %v3136_v21, %v4139_v35 }
 0x578   : > { %v3138_v24 = vpop.eup %3137 }
 0x579   : > { %2431 = vst [vmem:[%s4250_s23 + $0x20] sm:$0xff] %v2372_v23  ;;  %v2374_v19 = vmul.f32 %v3138_v24, %v4142_v37 }
 0x57b   : > { %2432 = vst [vmem:[%s4250_s23 + $0x28] sm:$0xff] %v2374_v19  ;;  %v2316_v49 = vpop.xlane.xlu0 %2315 }
 0x57c   : > { %3143 = vrcp.f32 %v2316_v49 }
 0x57d   : > { %v2318_v25 = vpop.xlane.xlu1 %2317 }
 0x57e   : > { %v3140_v55 = vpop.eup %3139  ;;  %3145 = vrcp.f32 %v2318_v25 }
 0x57f   : > { %v2376_v20 = vmul.f32 %v3140_v55, %v4147_v51 }
 0x580   : > { %v3142_v30 = vpop.eup %3141 }
 0x581   : > { %2433 = vst [vmem:[%s4250_s23 + $0x30] sm:$0xff] %v2376_v20  ;;  %v2378_v31 = vmul.f32 %v3142_v30, %v4150_v57 }
 0x583   : > { %2434 = vst [vmem:[%s4250_s23 + $0x38] sm:$0xff] %v2378_v31  ;;  %v2320_v35 = vpop.xlane.xlu0 %2319 }
 0x584   : > { %3147 = vrcp.f32 %v2320_v35 }
 0x585   : > { %v2322_v58 = vpop.xlane.xlu1 %2321 }
 0x586   : > { %v3144_v37 = vpop.eup %3143  ;;  %3149 = vrcp.f32 %v2322_v58 }
 0x587   : > { %v2380_v29 = vmul.f32 %v3144_v37, %v4155_v4 }
 0x588   : > { %v3146_v56 = vpop.eup %3145 }
 0x589   : > { %2435 = vst [vmem:[%s4250_s23 + $0x40] sm:$0xff] %v2380_v29  ;;  %v2382_v32 = vmul.f32 %v3146_v56, %v4158_v40 }
 0x58b   : > { %2436 = vst [vmem:[%s4250_s23 + $0x48] sm:$0xff] %v2382_v32  ;;  %v2324_v51 = vpop.xlane.xlu0 %2323 }
 0x58c   : > { %3151 = vrcp.f32 %v2324_v51 }
 0x58d   : > { %v2326_v39 = vpop.xlane.xlu1 %2325 }
 0x58e   : > { %v3148_v57 = vpop.eup %3147  ;;  %3153 = vrcp.f32 %v2326_v39 }
 0x58f   : > { %v2384_v0 = vmul.f32 %v3148_v57, %v4163_v12 }
 0x590   : > { %v3150_v48 = vpop.eup %3149 }
 0x591   : > { %2437 = vst [vmem:[%s4250_s23 + $0x50] sm:$0xff] %v2384_v0  ;;  %v2386_v43 = vmul.f32 %v3150_v48, %v4166_v33 }
 0x593   : > { %2438 = vst [vmem:[%s4250_s23 + $0x58] sm:$0xff] %v2386_v43  ;;  %v2328_v4 = vpop.xlane.xlu0 %2327 }
 0x594   : > { %3155 = vrcp.f32 %v2328_v4 }
 0x595   : > { %v2330_v50 = vpop.xlane.xlu1 %2329 }
 0x596   : > { %v3152_v40 = vpop.eup %3151  ;;  %3157 = vrcp.f32 %v2330_v50 }
 0x597   : > { %v2388_v46 = vmul.f32 %v3152_v40, %v4171_v38 }
 0x598   : > { %v3154_v60 = vpop.eup %3153 }
 0x599   : > { %2439 = vst [vmem:[%s4250_s23 + $0x60] sm:$0xff] %v2388_v46  ;;  %v2390_v53 = vmul.f32 %v3154_v60, %v4174_v47 }
 0x59b   : > { %2440 = vst [vmem:[%s4250_s23 + $0x68] sm:$0xff] %v2390_v53  ;;  %v2332_v12 = vpop.xlane.xlu0 %2331 }
 0x59c   : > { %3159 = vrcp.f32 %v2332_v12 }
 0x59d   : > { %v2334_v7 = vpop.xlane.xlu1 %2333 }
 0x59e   : > { %v3156_v33 = vpop.eup %3155  ;;  %3161 = vrcp.f32 %v2334_v7 }
 0x59f   : > { %v2392_v41 = vmul.f32 %v3156_v33, %v4179_v28 }
 0x5a0   : > { %v3158_v5 = vpop.eup %3157 }
 0x5a1   : > { %2441 = vst [vmem:[%s4250_s23 + $0x70] sm:$0xff] %v2392_v41  ;;  %v2394_v62 = vmul.f32 %v3158_v5, %v4182_v34 }
 0x5a3   : > { %2442 = vst [vmem:[%s4250_s23 + $0x78] sm:$0xff] %v2394_v62  ;;  %v2336_v38 = vpop.xlane.xlu0 %2335 }
 0x5a4   : > { %3163 = vrcp.f32 %v2336_v38 }
 0x5a5   : > { %v2338_v6 = vpop.xlane.xlu1 %2337 }
 0x5a6   : > { %v3160_v47 = vpop.eup %3159  ;;  %3165 = vrcp.f32 %v2338_v6 }
 0x5a7   : > { %v2396_v2 = vmul.f32 %v3160_v47, %v4187_v42 }
 0x5a8   : > { %v3162_v14 = vpop.eup %3161 }
 0x5a9   : > { %2443 = vst [vmem:[%s4250_s23 + $0x80] sm:$0xff] %v2396_v2  ;;  %v2398_v15 = vmul.f32 %v3162_v14, %v4190_v1 }
 0x5ab   : > { %2444 = vst [vmem:[%s4250_s23 + $0x88] sm:$0xff] %v2398_v15  ;;  %v2340_v28 = vpop.xlane.xlu0 %2339 }
 0x5ac   : > { %3167 = vrcp.f32 %v2340_v28 }
 0x5ad   : > { %v2342_v13 = vpop.xlane.xlu1 %2341 }
 0x5ae   : > { %v3164_v34 = vpop.eup %3163  ;;  %3169 = vrcp.f32 %v2342_v13 }
 0x5af   : > { %v2400_v16 = vmul.f32 %v3164_v34, %v4195_v61 }
 0x5b0   : > { %v3166_v9 = vpop.eup %3165 }
 0x5b1   : > { %2445 = vst [vmem:[%s4250_s23 + $0x90] sm:$0xff] %v2400_v16  ;;  %v2402_v17 = vmul.f32 %v3166_v9, %v4198_v3 }
 0x5b3   : > { %2446 = vst [vmem:[%s4250_s23 + $0x98] sm:$0xff] %v2402_v17  ;;  %v2344_v42 = vpop.xlane.xlu0 %2343 }
 0x5b4   : > { %3171 = vrcp.f32 %v2344_v42 }
 0x5b5   : > { %v2346_v10 = vpop.xlane.xlu1 %2345 }
 0x5b6   : > { %v3168_v1 = vpop.eup %3167  ;;  %3173 = vrcp.f32 %v2346_v10 }
 0x5b7   : > { %v2404_v22 = vmul.f32 %v3168_v1, %v4203_v8 }
 0x5b8   : > { %v3170_v21 = vpop.eup %3169 }
 0x5b9   : > { %2447 = vst [vmem:[%s4250_s23 + $0xa0] sm:$0xff] %v2404_v22  ;;  %v2406_v23 = vmul.f32 %v3170_v21, %v4206_v11 }
 0x5bb   : > { %2448 = vst [vmem:[%s4250_s23 + $0xa8] sm:$0xff] %v2406_v23  ;;  %v2348_v61 = vpop.xlane.xlu0 %2347 }
 0x5bc   : > { %3175 = vrcp.f32 %v2348_v61 }
 0x5bd   : > { %v2350_v24 = vpop.xlane.xlu1 %2349 }
 0x5be   : > { %v3172_v3 = vpop.eup %3171  ;;  %3177 = vrcp.f32 %v2350_v24 }
 0x5bf   : > { %v2408_v19 = vmul.f32 %v3172_v3, %v4211_v44 }
 0x5c0   : > { %v3174_v49 = vpop.eup %3173 }
 0x5c1   : > { %2449 = vst [vmem:[%s4250_s23 + $0xb0] sm:$0xff] %v2408_v19  ;;  %v2410_v25 = vmul.f32 %v3174_v49, %v4214_v18 }
 0x5c3   : > { %2450 = vst [vmem:[%s4250_s23 + $0xb8] sm:$0xff] %v2410_v25  ;;  %v2352_v8 = vpop.xlane.xlu0 %2351 }
 0x5c4   : > { %3179 = vrcp.f32 %v2352_v8 }
 0x5c5   : > { %v2354_v55 = vpop.xlane.xlu1 %2353 }
 0x5c6   : > { %v3176_v11 = vpop.eup %3175  ;;  %3181 = vrcp.f32 %v2354_v55 }
 0x5c7   : > { %v2412_v20 = vmul.f32 %v3176_v11, %v4219_v26 }
 0x5c8   : > { %v3178_v30 = vpop.eup %3177 }
 0x5c9   : > { %2451 = vst [vmem:[%s4250_s23 + $0xc0] sm:$0xff] %v2412_v20  ;;  %v2414_v31 = vmul.f32 %v3178_v30, %v4222_v27 }
 0x5cb   : > { %2452 = vst [vmem:[%s4250_s23 + $0xc8] sm:$0xff] %v2414_v31  ;;  %v2356_v44 = vpop.xlane.xlu0 %2355 }
 0x5cc   : > { %3183 = vrcp.f32 %v2356_v44 }
 0x5cd   : > { %v2358_v35 = vpop.xlane.xlu1 %2357 }
 0x5ce   : > { %v3180_v18 = vpop.eup %3179  ;;  %3185 = vrcp.f32 %v2358_v35 }
 0x5cf   : > { %v2416_v58 = vmul.f32 %v3180_v18, %v4227_v36 }
 0x5d0   : > { %v3182_v37 = vpop.eup %3181 }
 0x5d1   : > { %2453 = vst [vmem:[%s4250_s23 + $0xd0] sm:$0xff] %v2416_v58  ;;  %v2418_v26 = vmul.f32 %v3182_v37, %v4230_v63 }
 0x5d3   : > { %2454 = vst [vmem:[%s4250_s23 + $0xd8] sm:$0xff] %v2418_v26  ;;  %v2360_v29 = vpop.xlane.xlu0 %2359 }
 0x5d4   : > { %3187 = vrcp.f32 %v2360_v29 }
 0x5d5   : > { %v2362_v27 = vpop.xlane.xlu1 %2361 }
 0x5d6   : > { %v3184_v56 = vpop.eup %3183  ;;  %3189 = vrcp.f32 %v2362_v27 }
 0x5d7   : > { %v2420_v32 = vmul.f32 %v3184_v56, %v4235_v54 }
 0x5d8   : > { %v3186_v51 = vpop.eup %3185 }
 0x5d9   : > { %2455 = vst [vmem:[%s4250_s23 + $0xe0] sm:$0xff] %v2420_v32  ;;  %v2422_v36 = vmul.f32 %v3186_v51, %v4238_v52 }
 0x5db   : > { %2456 = vst [vmem:[%s4250_s23 + $0xe8] sm:$0xff] %v2422_v36 }
 0x5de   : > { %v3188_v63 = vpop.eup %3187 }
 0x5df   : > { %v2424_v39 = vmul.f32 %v3188_v63, %v4241_v59 }
 0x5e0   : > { %v3190_v57 = vpop.eup %3189 }
 0x5e1   : > { %2457 = vst [vmem:[%s4250_s23 + $0xf0] sm:$0xff] %v2424_v39  ;;  %v2426_v54 = vmul.f32 %v3190_v57, %v4244_v45 }
 0x5e3   : > { %2458 = vst [vmem:[%s4250_s23 + $0xf8] sm:$0xff] %v2426_v54 }
 0x5e4   : > { %3346 = shalt.err (!%p3343_p13)
}
 0x5e5   : > { %s3347_s28 = scalar_lea.hbm %s4317_s17, 4096  ;;  %s3351_s16 = scalar_lea.hbm %s4400_s15, 8192 }
 0x5e6   : > { %p3348_p9 = scmp.ne.s32.totalorder %s4317_s17, %s3347_s28  ;;  %p3352_p4 = scmp.lt.u32.totalorder %s4317_s17, %s4400_s15 }
 0x5e7   : > { %p3353_p8 = scmp.lt.u32.totalorder %s3351_s16, %s3347_s28  ;;  %p3355_p10 = scmp.lt.u32.totalorder %s3347_s28, %s4317_s17 }
 0x5e8   : > { %p3349_p0 = pnand %p3348_p9, %p3643_p3 }
 0x5e9   : > { %p3354_p6 = por %p3353_p8, %p3352_p4 }
 0x5ea   : > { %p3350_p11 = pneg %p3349_p0 }
 0x5eb   : > { %p3356_p5 = por %p3355_p10, %p3354_p6 }
 0x5ed   : > { %p3357_p7 = pnand %p3356_p5, %p3350_p11 }
 0x5ef   : > { %3360 = shalt.err (!%p3357_p7)
}
 0x5f0   : > { %s3420_s30 = smov 128   ;;  %s3421_s25 = smov 8  }
 0x5f1   : > { %2851 = dma.vmem_to_hbm [thread:$0]  (%p3643_p3), %s4319_s24, 4096, %s4317_s17, %s2460_s13, %s3420_s30, %s3420_s30, %s3421_s25  }
 0x5f2 PF: > { %s4401_s26 = sld [smem:[#allocation16_spill]]  ;;  %s4402_s22 = sld [smem:[#allocation17_spill]] }
 0x5f3   : > { %p4404_p1 = scmp.ge.s32.totalorder %s3407_s12, 2 }
 0x5f8   : > { %s2488_s9 = sand.u32 1, %s4401_s26   ;;  %p4403_p12 = scmp.ne.s32.totalorder %s4402_s22, 0 }
 0x5f9   : > { %s2489_s28 = scalar_lea.sflag [#allocation4], %s2488_s9 }
 0x5fa   : > { %p2871_p2 = pnand %p4404_p1, %p4403_p12 }
 0x5fc   : > { %3390 = dma.done.wait (!%p2871_p2), %s2489_s28, 4096  }
 0x5fd   : > { %3392 = vsyncadd (!%p2871_p2), %s2489_s28, 4294963200  ;;  %p24_p13 = scmp.ge.s32.totalorder %s3630_s27, 4   ;;  %s4405_s30 = smov %s3399_s10 }
 0x5fe   : > { %s4406_s10 = smov %s3403_s11  ;;  %s4407_s11 = smov %s3639_s18 }
 0x5ff   : > { %s4408_s12 = smov %s3630_s27  ;;  %26 = sbr.rel (!%p24_p13) target bundleno = 9 (0x9), region = 117 }
 0x606   :  { %2494 = vsyncpa [#allocation3], 1 }
 0x607   :  { %2496 = vsyncpa [#allocation3 + $0x1], 1 }
 0x608   :  { %2497 = vsyncpa [#allocation6], 1 }
 0x609   :  { %2498 = vsyncpa [#allocation9], 1 }
 0x60a   :  { %2499 = vsyncpa [#allocation4], 1 }
 0x60b   :  { %2501 = vsyncpa [#allocation4 + $0x1], 1 }

</bundles_post_ra>
